<compile_context>
chip_gen: v7x
topology: tpu7x:2x2x1
jax: 0.10.0
libtpu: 0.0.40
codegen_flags: <defaults>
</compile_context>

<pallas_src>
import functools

import jax
import jax.numpy as jnp
from jax import lax
from jax.experimental import pallas as pl
from jax.experimental.pallas import tpu as pltpu

EPS = 1e-5
LANE = 128
VMEM_LIMIT = 48 * 1024 * 1024        # explicit scoped-VMEM request (fits all gens)
TILE_BUDGET = 32 * 1024 * 1024       # per-tile working-set budget (v7x headroom)


def _ceil_to(v, m):
    return ((v + m - 1) // m) * m


def _pick_row_tile(rows, cap=1024):
    if rows <= cap:
        return rows
    for t in range(cap, 7, -8):
        if rows % t == 0:
            return t
    return rows  # fallback: single block


def _pick_batch_tile(N, T, Cp, Hp, budget=TILE_BUDGET):
    def est(nt):
        return (2 * T * nt * Cp * 4          # x block (double-buffered)
                + 2 * T * nt * Hp * 4        # out block (double-buffered)
                + T * nt * 3 * Hp * 4        # xp scratch (f32)
                + 2 * (Cp + Hp) * 3 * Hp * 2  # bf16 weights (double-buffered)
                + 8 * Hp * 4)                # biases
    cands = [d for d in range(128, 7, -8) if d <= N and N % d == 0]
    cands.append(N)
    for nt in cands:
        if est(nt) <= budget:
            return nt
    return cands[-1]


# ----------------------------------------------------------------------------
# Kernel 1: BatchNorm1d batch statistics -> per-channel (scale, shift).
# Grid is a reduction over row tiles of the (rows, Cp) view.
# ----------------------------------------------------------------------------
def _bn_stats_kernel(x_ref, gamma_ref, beta_ref, scale_ref, shift_ref,
                     s1_ref, s2_ref, *, inv_rows):
    i = pl.program_id(0)

    @pl.when(i == 0)
    def _():
        s1_ref[...] = jnp.zeros_like(s1_ref)
        s2_ref[...] = jnp.zeros_like(s2_ref)

    xb = x_ref[...]
    s1_ref[...] += jnp.sum(xb, axis=0, keepdims=True)
    s2_ref[...] += jnp.sum(xb * xb, axis=0, keepdims=True)

    @pl.when(i == pl.num_programs(0) - 1)
    def _():
        mean = s1_ref[...] * inv_rows
        var = jnp.maximum(s2_ref[...] * inv_rows - mean * mean, 0.0)  # biased var
        sc = gamma_ref[...] * lax.rsqrt(var + EPS)
        scale_ref[...] = sc
        shift_ref[...] = beta_ref[...] - mean * sc


def bn_stats(x2, gamma_p, beta_p):
    rows, Cp = x2.shape
    Rt = _pick_row_tile(rows)
    kernel = functools.partial(_bn_stats_kernel, inv_rows=1.0 / rows)
    scale, shift = pl.pallas_call(
        kernel,
        grid=(rows // Rt,),
        in_specs=[
            pl.BlockSpec((Rt, Cp), lambda i: (i, 0)),
            pl.BlockSpec((1, Cp), lambda i: (0, 0)),
            pl.BlockSpec((1, Cp), lambda i: (0, 0)),
        ],
        out_specs=[
            pl.BlockSpec((1, Cp), lambda i: (0, 0)),
            pl.BlockSpec((1, Cp), lambda i: (0, 0)),
        ],
        out_shape=[
            jax.ShapeDtypeStruct((1, Cp), jnp.float32),
            jax.ShapeDtypeStruct((1, Cp), jnp.float32),
        ],
        scratch_shapes=[
            pltpu.VMEM((1, Cp), jnp.float32),
            pltpu.VMEM((1, Cp), jnp.float32),
        ],
        compiler_params=pltpu.CompilerParams(
            dimension_semantics=("arbitrary",),
            vmem_limit_bytes=VMEM_LIMIT,
        ),
    )(x2, gamma_p, beta_p)
    return scale, shift


# ----------------------------------------------------------------------------
# Kernel 2: GRU layer (BN already folded into w_eff/b_eff), time-major,
# gridded over the batch dimension ("parallel").
# ----------------------------------------------------------------------------
def _gru_kernel(x_ref, w_eff_ref, b_eff_ref, w_hh_ref, b_hn_ref, out_ref, xp_ref):
    T, Nt, Cp = x_ref.shape
    Hp = w_hh_ref.shape[0]

    # Input projection for all timesteps at once: (T*Nt, Cp) @ (Cp, 3Hp) on the MXU.
    x = x_ref[...].reshape(T * Nt, Cp).astype(jnp.bfloat16)
    xp = jnp.dot(x, w_eff_ref[...], preferred_element_type=jnp.float32) + b_eff_ref[...]
    xp_ref[...] = xp.reshape(T, Nt, 3 * Hp)

    w_hh = w_hh_ref[...]          # bf16, loop-invariant
    b_hn = b_hn_ref[...]          # (1, Hp) f32, hoisted out of the loop

    h0 = jnp.zeros((Nt, Hp), jnp.float32)

    def step(t, h):
        gi = xp_ref[pl.ds(t, 1), :, :].reshape(Nt, 3 * Hp)      # lane-dense slab
        gh = jnp.dot(h.astype(jnp.bfloat16), w_hh,
                     preferred_element_type=jnp.float32)
        r = jax.nn.sigmoid(gi[:, :Hp] + gh[:, :Hp])
        z = jax.nn.sigmoid(gi[:, Hp:2 * Hp] + gh[:, Hp:2 * Hp])
        n = jnp.tanh(gi[:, 2 * Hp:] + r * (gh[:, 2 * Hp:] + b_hn))
        h_new = (1.0 - z) * n + z * h
        out_ref[pl.ds(t, 1), :, :] = h_new.reshape(1, Nt, Hp)
        return h_new

    lax.fori_loop(0, T, step, h0, unroll=(True if T <= 32 else 4))


def gru_layer(x_tm, w_eff, b_eff, w_hh, b_hn):
    """x_tm: (T, N, Cp) time-major -> (T, N, Hp)."""
    T, N, Cp = x_tm.shape
    Hp = w_hh.shape[0]
    Nt = _pick_batch_tile(N, T, Cp, Hp)
    return pl.pallas_call(
        _gru_kernel,
        grid=(N // Nt,),
        in_specs=[
            pl.BlockSpec((T, Nt, Cp), lambda i: (0, i, 0)),
            pl.BlockSpec((Cp, 3 * Hp), lambda i: (0, 0)),
            pl.BlockSpec((1, 3 * Hp), lambda i: (0, 0)),
            pl.BlockSpec((Hp, 3 * Hp), lambda i: (0, 0)),
            pl.BlockSpec((1, Hp), lambda i: (0, 0)),
        ],
        out_specs=pl.BlockSpec((T, Nt, Hp), lambda i: (0, i, 0)),
        out_shape=jax.ShapeDtypeStruct((T, N, Hp), jnp.float32),
        scratch_shapes=[pltpu.VMEM((T, Nt, 3 * Hp), jnp.float32)],
        compiler_params=pltpu.CompilerParams(
            dimension_semantics=("parallel",),
            vmem_limit_bytes=VMEM_LIMIT,
        ),
    )(x_tm, w_eff, b_eff, w_hh, b_hn)


# ----------------------------------------------------------------------------
# Kernel 3: head linear (BN folded into w/b), gridded over rows.
# ----------------------------------------------------------------------------
def _linear_kernel(x_ref, w_ref, b_ref, o_ref):
    o_ref[...] = jnp.dot(x_ref[...].astype(jnp.bfloat16), w_ref[...],
                         preferred_element_type=jnp.float32) + b_ref[...]


def linear_head(x2, w, b):
    rows, Hp = x2.shape
    Clsp = w.shape[1]
    Rt = _pick_row_tile(rows, cap=512)
    return pl.pallas_call(
        _linear_kernel,
        grid=(rows // Rt,),
        in_specs=[
            pl.BlockSpec((Rt, Hp), lambda i: (i, 0)),
            pl.BlockSpec((Hp, Clsp), lambda i: (0, 0)),
            pl.BlockSpec((1, Clsp), lambda i: (0, 0)),
        ],
        out_specs=pl.BlockSpec((Rt, Clsp), lambda i: (i, 0)),
        out_shape=jax.ShapeDtypeStruct((rows, Clsp), jnp.float32),
        compiler_params=pltpu.CompilerParams(
            dimension_semantics=("parallel",),
            vmem_limit_bytes=VMEM_LIMIT,
        ),
    )(x2, w, b)


# ----------------------------------------------------------------------------
# Parameter init (PyTorch-default-like) and packing into padded kernel layouts.
# ----------------------------------------------------------------------------
def init_params(key, input_size, hidden_layer, hidden_size, num_classes):
    layers = []
    in_sizes = [input_size] + [hidden_size] * hidden_layer     # hidden_layer+1 blocks
    k_rnn = 1.0 / jnp.sqrt(hidden_size)
    for c_in in in_sizes:
        key, k1, k2, k3, k4 = jax.random.split(key, 5)
        layers.append({
            'bn_g': jnp.ones((c_in,), jnp.float32),
            'bn_b': jnp.zeros((c_in,), jnp.float32),
            'w_ih': jax.random.uniform(k1, (3 * hidden_size, c_in),
                                       jnp.float32, -k_rnn, k_rnn),
            'w_hh': jax.random.uniform(k2, (3 * hidden_size, hidden_size),
                                       jnp.float32, -k_rnn, k_rnn),
            'b_ih': jax.random.uniform(k3, (3 * hidden_size,),
                                       jnp.float32, -k_rnn, k_rnn),
            'b_hh': jax.random.uniform(k4, (3 * hidden_size,),
                                       jnp.float32, -k_rnn, k_rnn),
        })
    key, k1, k2 = jax.random.split(key, 3)
    k_lin = 1.0 / jnp.sqrt(hidden_size)
    conn = {
        'bn_g': jnp.ones((hidden_size,), jnp.float32),
        'bn_b': jnp.zeros((hidden_size,), jnp.float32),
        'w': jax.random.uniform(k1, (num_classes, hidden_size),
                                jnp.float32, -k_lin, k_lin),
        'b': jax.random.uniform(k2, (num_classes,), jnp.float32, -k_lin, k_lin),
    }
    return {'layers': layers, 'conn': conn}


def pack_params(params, hidden_size, num_classes):
    """Pad/repack PyTorch-layout params into 128-aligned, gate-blocked layouts."""
    H = hidden_size
    Hp = _ceil_to(H, LANE)
    packed_layers = []
    for lp in params['layers']:
        C = lp['w_ih'].shape[1]
        Cp = _ceil_to(C, LANE)
        # (3H, C) -> (C, 3, H) gate-blocked, zero-padded to (Cp, 3, Hp)
        w_ih_g = jnp.transpose(lp['w_ih'].reshape(3, H, C), (2, 0, 1))
        w_ih_p = jnp.zeros((Cp, 3, Hp), jnp.float32).at[:C, :, :H].set(w_ih_g)
        w_ih_p = w_ih_p.reshape(Cp, 3 * Hp)
        w_hh_g = jnp.transpose(lp['w_hh'].reshape(3, H, H), (2, 0, 1))
        w_hh_p = jnp.zeros((Hp, 3, Hp), jnp.float32).at[:H, :, :H].set(w_hh_g)
        w_hh_p = w_hh_p.reshape(Hp, 3 * Hp)
        b_ih = lp['b_ih'].reshape(3, H)
        b_hh = lp['b_hh'].reshape(3, H)
        # Fold b_hr/b_hz into the input-projection bias; keep b_hn separate.
        b_x = jnp.stack([b_ih[0] + b_hh[0], b_ih[1] + b_hh[1], b_ih[2]], axis=0)
        b_x_p = jnp.zeros((3, Hp), jnp.float32).at[:, :H].set(b_x).reshape(1, 3 * Hp)
        b_hn_p = jnp.zeros((1, Hp), jnp.float32).at[0, :H].set(b_hh[2])
        gamma_p = jnp.zeros((1, Cp), jnp.float32).at[0, :C].set(lp['bn_g'])
        beta_p = jnp.zeros((1, Cp), jnp.float32).at[0, :C].set(lp['bn_b'])
        packed_layers.append(dict(
            w_ih_p=w_ih_p,                              # f32; BN-scaled then cast bf16
            w_hh_bf16=w_hh_p.astype(jnp.bfloat16),
            b_x_p=b_x_p, b_hn_p=b_hn_p,
            gamma_p=gamma_p, beta_p=beta_p,
        ))
    c = params['conn']
    Clsp = _ceil_to(num_classes, LANE)
    w_p = jnp.zeros((Hp, Clsp), jnp.float32).at[:H, :num_classes].set(c['w'].T)
    b_p = jnp.zeros((1, Clsp), jnp.float32).at[0, :num_classes].set(c['b'])
    gamma_h = jnp.zeros((1, Hp), jnp.float32).at[0, :H].set(c['bn_g'])
    beta_h = jnp.zeros((1, Hp), jnp.float32).at[0, :H].set(c['bn_b'])
    return dict(layers=packed_layers,
                conn=dict(w_p=w_p, b_p=b_p, gamma_p=gamma_h, beta_p=beta_h))


# ----------------------------------------------------------------------------
# Forward pass.
# ----------------------------------------------------------------------------
@functools.partial(jax.jit, static_argnames=('num_classes',))
def rnn_forward(x, packed, num_classes):
    N, T, C0 = x.shape
    Cp0 = packed['layers'][0]['w_ih_p'].shape[0]

    # Layout plumbing only: time-major + lane-padded activations inside the stack.
    xt = jnp.transpose(x, (1, 0, 2)).astype(jnp.float32)        # (T, N, C0)
    if C0 < Cp0:
        xt = jnp.pad(xt, ((0, 0), (0, 0), (0, Cp0 - C0)))

    for lp in packed['layers']:
        Cp = lp['w_ih_p'].shape[0]
        x2 = xt.reshape(T * N, Cp)
        scale, shift = bn_stats(x2, lp['gamma_p'], lp['beta_p'])
        # Fold BatchNorm into the input projection (tiny O(Cp*3Hp) prep, once/layer).
        w_eff = (lp['w_ih_p'] * scale.reshape(Cp, 1)).astype(jnp.bfloat16)
        b_eff = lp['b_x_p'] + shift @ lp['w_ih_p']
        xt = gru_layer(xt, w_eff, b_eff, lp['w_hh_bf16'], lp['b_hn_p'])   # (T,N,Hp)

    Hp = xt.shape[-1]
    conn = packed['conn']
    x2 = xt.reshape(T * N, Hp)
    scale, shift = bn_stats(x2, conn['gamma_p'], conn['beta_p'])
    w_eff = (conn['w_p'] * scale.reshape(Hp, 1)).astype(jnp.bfloat16)
    b_eff = conn['b_p'] + shift @ conn['w_p']
    y = linear_head(x2, w_eff, b_eff)                            # (T*N, Clsp)

    Clsp = y.shape[-1]
    y = y.reshape(T, N, Clsp).transpose(1, 0, 2).reshape(N * T, Clsp)
    return y[:, :num_classes]


if __name__ == "__main__":
    N, T = 2, 8
    input_size, hidden_layer, hidden_size, num_classes = 16, 2, 32, 10

    key = jax.random.PRNGKey(0)
    key, kx = jax.random.split(key)
    x = jax.random.normal(kx, (N, T, input_size), jnp.float32)

    params = init_params(key, input_size, hidden_layer, hidden_size, num_classes)
    packed = pack_params(params, hidden_size, num_classes)

    out = rnn_forward(x, packed, num_classes=num_classes)       # (N*T, num_classes)
    jax.block_until_ready(out)
    assert out.shape == (N * T, num_classes), out.shape
    print("KERNEL_OK")
</pallas_src>

<mosaic_0001>
module attributes {stable_mosaic.version = 11 : i64} {
  func.func @_bn_stats_kernel(%arg0: i32, %arg1: memref<16x128xf32, #tpu.memory_space<vmem>>, %arg2: memref<1x128xf32, #tpu.memory_space<vmem>>, %arg3: memref<1x128xf32, #tpu.memory_space<vmem>>, %arg4: memref<1x128xf32, #tpu.memory_space<vmem>>, %arg5: memref<1x128xf32, #tpu.memory_space<vmem>>, %arg6: memref<1x128xf32, #tpu.memory_space<vmem>>, %arg7: memref<1x128xf32, #tpu.memory_space<vmem>>) attributes {dimension_semantics = [#tpu.dimension_semantics<arbitrary>], iteration_bounds = array<i64: 1>, scalar_prefetch = 0 : i64, scratch_operands = 2 : i64, tpu.core_type = #tpu.core_type<tc>, window_params = [{transform_indices = @transform_0, window_bounds = array<i64: 16, 128>}, {pipeline_mode = #tpu.pipeline_mode<synchronous>, transform_indices = @transform_1, window_bounds = array<i64: 1, 128>}, {pipeline_mode = #tpu.pipeline_mode<synchronous>, transform_indices = @transform_2, window_bounds = array<i64: 1, 128>}, {pipeline_mode = #tpu.pipeline_mode<synchronous>, transform_indices = @transform_3, window_bounds = array<i64: 1, 128>}, {pipeline_mode = #tpu.pipeline_mode<synchronous>, transform_indices = @transform_4, window_bounds = array<i64: 1, 128>}]} {
    %c0_i32 = arith.constant 0 : i32
    %0 = arith.cmpi eq, %arg0, %c0_i32 : i32
    %1 = arith.extui %0 : i1 to i32
    %c0_i32_0 = arith.constant 0 : i32
    %2 = arith.cmpi ne, %1, %c0_i32_0 : i32
    scf.if %2 {
      %cst_13 = arith.constant 0.000000e+00 : f32
      %18 = vector.broadcast %cst_13 : f32 to vector<1x128xf32>
      %c0_14 = arith.constant 0 : index
      %c0_15 = arith.constant 0 : index
      %19 = vector.load %arg6[%c0_14, %c0_15] : memref<1x128xf32, #tpu.memory_space<vmem>>, vector<1x128xf32>
      tpu.vector_store %arg6[%c0_14, %c0_15], %18 {strides = array<i32>} : memref<1x128xf32, #tpu.memory_space<vmem>>, vector<1x128xf32>,
      %cst_16 = arith.constant 0.000000e+00 : f32
      %20 = vector.broadcast %cst_16 : f32 to vector<1x128xf32>
      %c0_17 = arith.constant 0 : index
      %c0_18 = arith.constant 0 : index
      %21 = vector.load %arg7[%c0_17, %c0_18] : memref<1x128xf32, #tpu.memory_space<vmem>>, vector<1x128xf32>
      tpu.vector_store %arg7[%c0_17, %c0_18], %20 {strides = array<i32>} : memref<1x128xf32, #tpu.memory_space<vmem>>, vector<1x128xf32>,
    } else {
    }
    %c0 = arith.constant 0 : index
    %c0_1 = arith.constant 0 : index
    %3 = vector.load %arg1[%c0, %c0_1] : memref<16x128xf32, #tpu.memory_space<vmem>>, vector<16x128xf32>
    %c0_2 = arith.constant 0 : index
    %c0_3 = arith.constant 0 : index
    %4 = vector.load %arg6[%c0_2, %c0_3] : memref<1x128xf32, #tpu.memory_space<vmem>>, vector<1x128xf32>
    %cst = arith.constant dense<0.000000e+00> : vector<128xf32>
    %5 = vector.multi_reduction <add>, %3, %cst [0] : vector<16x128xf32> to vector<128xf32>
    %6 = vector.shape_cast %5 : vector<128xf32> to vector<1x128xf32>
    %7 = arith.addf %4, %6 : vector<1x128xf32>
    %c0_4 = arith.constant 0 : index
    %c0_5 = arith.constant 0 : index
    %8 = vector.load %arg6[%c0_4, %c0_5] : memref<1x128xf32, #tpu.memory_space<vmem>>, vector<1x128xf32>
    tpu.vector_store %arg6[%c0_4, %c0_5], %7 {strides = array<i32>} : memref<1x128xf32, #tpu.memory_space<vmem>>, vector<1x128xf32>,
    %c0_6 = arith.constant 0 : index
    %c0_7 = arith.constant 0 : index
    %9 = vector.load %arg7[%c0_6, %c0_7] : memref<1x128xf32, #tpu.memory_space<vmem>>, vector<1x128xf32>
    %10 = arith.mulf %3, %3 : vector<16x128xf32>
    %cst_8 = arith.constant dense<0.000000e+00> : vector<128xf32>
    %11 = vector.multi_reduction <add>, %10, %cst_8 [0] : vector<16x128xf32> to vector<128xf32>
    %12 = vector.shape_cast %11 : vector<128xf32> to vector<1x128xf32>
    %13 = arith.addf %9, %12 : vector<1x128xf32>
    %c0_9 = arith.constant 0 : index
    %c0_10 = arith.constant 0 : index
    %14 = vector.load %arg7[%c0_9, %c0_10] : memref<1x128xf32, #tpu.memory_space<vmem>>, vector<1x128xf32>
    tpu.vector_store %arg7[%c0_9, %c0_10], %13 {strides = array<i32>} : memref<1x128xf32, #tpu.memory_space<vmem>>, vector<1x128xf32>,
    %c0_i32_11 = arith.constant 0 : i32
    %15 = arith.cmpi eq, %arg0, %c0_i32_11 : i32
    %16 = arith.extui %15 : i1 to i32
    %c0_i32_12 = arith.constant 0 : i32
    %17 = arith.cmpi ne, %16, %c0_i32_12 : i32
    scf.if %17 {
      %c0_13 = arith.constant 0 : index
      %c0_14 = arith.constant 0 : index
      %18 = vector.load %arg6[%c0_13, %c0_14] : memref<1x128xf32, #tpu.memory_space<vmem>>, vector<1x128xf32>
      %cst_15 = arith.constant 6.250000e-02 : f32
      %19 = vector.broadcast %cst_15 : f32 to vector<1x128xf32>
      %20 = arith.mulf %18, %19 : vector<1x128xf32>
      %c0_16 = arith.constant 0 : index
      %c0_17 = arith.constant 0 : index
      %21 = vector.load %arg7[%c0_16, %c0_17] : memref<1x128xf32, #tpu.memory_space<vmem>>, vector<1x128xf32>
      %cst_18 = arith.constant 6.250000e-02 : f32
      %22 = vector.broadcast %cst_18 : f32 to vector<1x128xf32>
      %23 = arith.mulf %21, %22 : vector<1x128xf32>
      %24 = arith.mulf %20, %20 : vector<1x128xf32>
      %25 = arith.subf %23, %24 : vector<1x128xf32>
      %cst_19 = arith.constant 0.000000e+00 : f32
      %26 = vector.broadcast %cst_19 : f32 to vector<1x128xf32>
      %27 = arith.maximumf %25, %26 : vector<1x128xf32>
      %c0_20 = arith.constant 0 : index
      %c0_21 = arith.constant 0 : index
      %28 = vector.load %arg2[%c0_20, %c0_21] : memref<1x128xf32, #tpu.memory_space<vmem>>, vector<1x128xf32>
      %cst_22 = arith.constant 9.99999974E-6 : f32
      %29 = vector.broadcast %cst_22 : f32 to vector<1x128xf32>
      %30 = arith.addf %27, %29 : vector<1x128xf32>
      %31 = math.rsqrt %30 : vector<1x128xf32>
      %32 = arith.mulf %28, %31 : vector<1x128xf32>
      %c0_23 = arith.constant 0 : index
      %c0_24 = arith.constant 0 : index
      %33 = vector.load %arg4[%c0_23, %c0_24] : memref<1x128xf32, #tpu.memory_space<vmem>>, vector<1x128xf32>
      tpu.vector_store %arg4[%c0_23, %c0_24], %32 {strides = array<i32>} : memref<1x128xf32, #tpu.memory_space<vmem>>, vector<1x128xf32>,
      %c0_25 = arith.constant 0 : index
      %c0_26 = arith.constant 0 : index
      %34 = vector.load %arg3[%c0_25, %c0_26] : memref<1x128xf32, #tpu.memory_space<vmem>>, vector<1x128xf32>
      %35 = arith.mulf %20, %32 : vector<1x128xf32>
      %36 = arith.subf %34, %35 : vector<1x128xf32>
      %c0_27 = arith.constant 0 : index
      %c0_28 = arith.constant 0 : index
      %37 = vector.load %arg5[%c0_27, %c0_28] : memref<1x128xf32, #tpu.memory_space<vmem>>, vector<1x128xf32>
      tpu.vector_store %arg5[%c0_27, %c0_28], %36 {strides = array<i32>} : memref<1x128xf32, #tpu.memory_space<vmem>>, vector<1x128xf32>,
    } else {
    }
    return
  }
  func.func @transform_0(%arg0: i32) -> (i32, i32) {
    %c0_i32 = arith.constant 0 : i32
    %c0_i32_0 = arith.constant 0 : i32
    return %arg0, %c0_i32 : i32, i32
  }
  func.func @transform_1(%arg0: i32) -> (i32, i32) {
    %c0_i32 = arith.constant 0 : i32
    %c0_i32_0 = arith.constant 0 : i32
    %c0_i32_1 = arith.constant 0 : i32
    return %c0_i32, %c0_i32_0 : i32, i32
  }
  func.func @transform_2(%arg0: i32) -> (i32, i32) {
    %c0_i32 = arith.constant 0 : i32
    %c0_i32_0 = arith.constant 0 : i32
    %c0_i32_1 = arith.constant 0 : i32
    return %c0_i32, %c0_i32_0 : i32, i32
  }
  func.func @transform_3(%arg0: i32) -> (i32, i32) {
    %c0_i32 = arith.constant 0 : i32
    %c0_i32_0 = arith.constant 0 : i32
    %c0_i32_1 = arith.constant 0 : i32
    return %c0_i32, %c0_i32_0 : i32, i32
  }
  func.func @transform_4(%arg0: i32) -> (i32, i32) {
    %c0_i32 = arith.constant 0 : i32
    %c0_i32_0 = arith.constant 0 : i32
    %c0_i32_1 = arith.constant 0 : i32
    return %c0_i32, %c0_i32_0 : i32, i32
  }
}

module attributes {stable_mosaic.version = 11 : i64} {
  func.func @_gru_kernel(%arg0: i32, %arg1: memref<8x2x128xf32, #tpu.memory_space<vmem>>, %arg2: memref<128x384xbf16, #tpu.memory_space<vmem>>, %arg3: memref<1x384xf32, #tpu.memory_space<vmem>>, %arg4: memref<128x384xbf16, #tpu.memory_space<vmem>>, %arg5: memref<1x128xf32, #tpu.memory_space<vmem>>, %arg6: memref<8x2x128xf32, #tpu.memory_space<vmem>>, %arg7: memref<8x2x384xf32, #tpu.memory_space<vmem>>) attributes {dimension_semantics = [#tpu.dimension_semantics<parallel>], iteration_bounds = array<i64: 1>, scalar_prefetch = 0 : i64, scratch_operands = 1 : i64, tpu.core_type = #tpu.core_type<tc>, window_params = [{transform_indices = @transform_0, window_bounds = array<i64: 8, 2, 128>}, {pipeline_mode = #tpu.pipeline_mode<synchronous>, transform_indices = @transform_1, window_bounds = array<i64: 128, 384>}, {pipeline_mode = #tpu.pipeline_mode<synchronous>, transform_indices = @transform_2, window_bounds = array<i64: 1, 384>}, {pipeline_mode = #tpu.pipeline_mode<synchronous>, transform_indices = @transform_3, window_bounds = array<i64: 128, 384>}, {pipeline_mode = #tpu.pipeline_mode<synchronous>, transform_indices = @transform_4, window_bounds = array<i64: 1, 128>}, {transform_indices = @transform_5, window_bounds = array<i64: 8, 2, 128>}]} {
    %c0 = arith.constant 0 : index
    %c0_0 = arith.constant 0 : index
    %c0_1 = arith.constant 0 : index
    %0 = vector.load %arg1[%c0, %c0_0, %c0_1] : memref<8x2x128xf32, #tpu.memory_space<vmem>>, vector<8x2x128xf32>
    %1 = vector.shape_cast %0 : vector<8x2x128xf32> to vector<16x128xf32>
    %2 = arith.truncf %1 : vector<16x128xf32> to vector<16x128xbf16>
    %c0_2 = arith.constant 0 : index
    %c0_3 = arith.constant 0 : index
    %3 = vector.load %arg2[%c0_2, %c0_3] : memref<128x384xbf16, #tpu.memory_space<vmem>>, vector<128x384xbf16>
    %cst = arith.constant dense<0.000000e+00> : vector<16x384xf32>
    %4 = tpu.matmul %2, %3, %cst {dimension_numbers = #tpu.dot_dimension_numbers<[1], [0], [0], [1], [0, 0, 1, 1], [], []>} : vector<16x128xbf16>, vector<128x384xbf16>, vector<16x384xf32> -> vector<16x384xf32>
    %c0_4 = arith.constant 0 : index
    %c0_5 = arith.constant 0 : index
    %5 = vector.load %arg3[%c0_4, %c0_5] : memref<1x384xf32, #tpu.memory_space<vmem>>, vector<1x384xf32>
    %6 = vector.broadcast %5 : vector<1x384xf32> to vector<16x384xf32>
    %7 = arith.addf %4, %6 : vector<16x384xf32>
    %8 = vector.shape_cast %7 : vector<16x384xf32> to vector<8x2x384xf32>
    %c0_6 = arith.constant 0 : index
    %c0_7 = arith.constant 0 : index
    %c0_8 = arith.constant 0 : index
    %9 = vector.load %arg7[%c0_6, %c0_7, %c0_8] : memref<8x2x384xf32, #tpu.memory_space<vmem>>, vector<8x2x384xf32>
    tpu.vector_store %arg7[%c0_6, %c0_7, %c0_8], %8 {strides = array<i32>} : memref<8x2x384xf32, #tpu.memory_space<vmem>>, vector<8x2x384xf32>,
    %c0_9 = arith.constant 0 : index
    %c0_10 = arith.constant 0 : index
    %10 = vector.load %arg4[%c0_9, %c0_10] : memref<128x384xbf16, #tpu.memory_space<vmem>>, vector<128x384xbf16>
    %c0_11 = arith.constant 0 : index
    %c0_12 = arith.constant 0 : index
    %11 = vector.load %arg5[%c0_11, %c0_12] : memref<1x128xf32, #tpu.memory_space<vmem>>, vector<1x128xf32>
    %cst_13 = arith.constant 0.000000e+00 : f32
    %12 = vector.broadcast %cst_13 : f32 to vector<2x128xf32>
    %c0_i32 = arith.constant 0 : i32
    %13 = arith.index_cast %c0_i32 : i32 to index
    %c0_14 = arith.constant 0 : index
    %c0_15 = arith.constant 0 : index
    %14 = vector.load %arg7[%13, %c0_14, %c0_15] : memref<8x2x384xf32, #tpu.memory_space<vmem>>, vector<1x2x384xf32>
    %15 = vector.shape_cast %14 : vector<1x2x384xf32> to vector<2x384xf32>
    %16 = arith.truncf %12 : vector<2x128xf32> to vector<2x128xbf16>
    %cst_16 = arith.constant dense<0.000000e+00> : vector<2x384xf32>
    %17 = tpu.matmul %16, %10, %cst_16 {dimension_numbers = #tpu.dot_dimension_numbers<[1], [0], [0], [1], [0, 0, 1, 1], [], []>} : vector<2x128xbf16>, vector<128x384xbf16>, vector<2x384xf32> -> vector<2x384xf32>
    %18 = vector.extract_strided_slice %15 {offsets = [0, 0], sizes = [2, 128], strides = [1, 1]} : vector<2x384xf32> to vector<2x128xf32>
    %19 = vector.extract_strided_slice %17 {offsets = [0, 0], sizes = [2, 128], strides = [1, 1]} : vector<2x384xf32> to vector<2x128xf32>
    %20 = arith.addf %18, %19 : vector<2x128xf32>
    %21 = arith.negf %20 : vector<2x128xf32>
    %22 = math.exp %21 : vector<2x128xf32>
    %cst_17 = arith.constant 1.000000e+00 : f32
    %23 = vector.broadcast %cst_17 : f32 to vector<2x128xf32>
    %24 = arith.addf %23, %22 : vector<2x128xf32>
    %25 = arith.divf %23, %24 : vector<2x128xf32>
    %26 = vector.extract_strided_slice %15 {offsets = [0, 128], sizes = [2, 128], strides = [1, 1]} : vector<2x384xf32> to vector<2x128xf32>
    %27 = vector.extract_strided_slice %17 {offsets = [0, 128], sizes = [2, 128], strides = [1, 1]} : vector<2x384xf32> to vector<2x128xf32>
    %28 = arith.addf %26, %27 : vector<2x128xf32>
    %29 = arith.negf %28 : vector<2x128xf32>
    %30 = math.exp %29 : vector<2x128xf32>
    %cst_18 = arith.constant 1.000000e+00 : f32
    %31 = vector.broadcast %cst_18 : f32 to vector<2x128xf32>
    %32 = arith.addf %31, %30 : vector<2x128xf32>
    %33 = arith.divf %31, %32 : vector<2x128xf32>
    %34 = vector.extract_strided_slice %15 {offsets = [0, 256], sizes = [2, 128], strides = [1, 1]} : vector<2x384xf32> to vector<2x128xf32>
    %35 = vector.extract_strided_slice %17 {offsets = [0, 256], sizes = [2, 128], strides = [1, 1]} : vector<2x384xf32> to vector<2x128xf32>
    %36 = vector.broadcast %11 : vector<1x128xf32> to vector<2x128xf32>
    %37 = arith.addf %35, %36 : vector<2x128xf32>
    %38 = arith.mulf %25, %37 : vector<2x128xf32>
    %39 = arith.addf %34, %38 : vector<2x128xf32>
    %40 = math.tanh %39 : vector<2x128xf32>
    %cst_19 = arith.constant 1.000000e+00 : f32
    %41 = vector.broadcast %cst_19 : f32 to vector<2x128xf32>
    %42 = arith.subf %41, %33 : vector<2x128xf32>
    %43 = arith.mulf %42, %40 : vector<2x128xf32>
    %44 = arith.mulf %33, %12 : vector<2x128xf32>
    %45 = arith.addf %43, %44 : vector<2x128xf32>
    %46 = vector.shape_cast %45 : vector<2x128xf32> to vector<1x2x128xf32>
    %47 = arith.index_cast %c0_i32 : i32 to index
    %c0_20 = arith.constant 0 : index
    %c0_21 = arith.constant 0 : index
    %48 = vector.load %arg6[%47, %c0_20, %c0_21] : memref<8x2x128xf32, #tpu.memory_space<vmem>>, vector<1x2x128xf32>
    tpu.vector_store %arg6[%47, %c0_20, %c0_21], %46 {strides = array<i32>} : memref<8x2x128xf32, #tpu.memory_space<vmem>>, vector<1x2x128xf32>,
    %c1_i32 = arith.constant 1 : i32
    %49 = arith.index_cast %c1_i32 : i32 to index
    %c0_22 = arith.constant 0 : index
    %c0_23 = arith.constant 0 : index
    %50 = vector.load %arg7[%49, %c0_22, %c0_23] : memref<8x2x384xf32, #tpu.memory_space<vmem>>, vector<1x2x384xf32>
    %51 = vector.shape_cast %50 : vector<1x2x384xf32> to vector<2x384xf32>
    %52 = arith.truncf %45 : vector<2x128xf32> to vector<2x128xbf16>
    %cst_24 = arith.constant dense<0.000000e+00> : vector<2x384xf32>
    %53 = tpu.matmul %52, %10, %cst_24 {dimension_numbers = #tpu.dot_dimension_numbers<[1], [0], [0], [1], [0, 0, 1, 1], [], []>} : vector<2x128xbf16>, vector<128x384xbf16>, vector<2x384xf32> -> vector<2x384xf32>
    %54 = vector.extract_strided_slice %51 {offsets = [0, 0], sizes = [2, 128], strides = [1, 1]} : vector<2x384xf32> to vector<2x128xf32>
    %55 = vector.extract_strided_slice %53 {offsets = [0, 0], sizes = [2, 128], strides = [1, 1]} : vector<2x384xf32> to vector<2x128xf32>
    %56 = arith.addf %54, %55 : vector<2x128xf32>
    %57 = arith.negf %56 : vector<2x128xf32>
    %58 = math.exp %57 : vector<2x128xf32>
    %cst_25 = arith.constant 1.000000e+00 : f32
    %59 = vector.broadcast %cst_25 : f32 to vector<2x128xf32>
    %60 = arith.addf %59, %58 : vector<2x128xf32>
    %61 = arith.divf %59, %60 : vector<2x128xf32>
    %62 = vector.extract_strided_slice %51 {offsets = [0, 128], sizes = [2, 128], strides = [1, 1]} : vector<2x384xf32> to vector<2x128xf32>
    %63 = vector.extract_strided_slice %53 {offsets = [0, 128], sizes = [2, 128], strides = [1, 1]} : vector<2x384xf32> to vector<2x128xf32>
    %64 = arith.addf %62, %63 : vector<2x128xf32>
    %65 = arith.negf %64 : vector<2x128xf32>
    %66 = math.exp %65 : vector<2x128xf32>
    %cst_26 = arith.constant 1.000000e+00 : f32
    %67 = vector.broadcast %cst_26 : f32 to vector<2x128xf32>
    %68 = arith.addf %67, %66 : vector<2x128xf32>
    %69 = arith.divf %67, %68 : vector<2x128xf32>
    %70 = vector.extract_strided_slice %51 {offsets = [0, 256], sizes = [2, 128], strides = [1, 1]} : vector<2x384xf32> to vector<2x128xf32>
    %71 = vector.extract_strided_slice %53 {offsets = [0, 256], sizes = [2, 128], strides = [1, 1]} : vector<2x384xf32> to vector<2x128xf32>
    %72 = vector.broadcast %11 : vector<1x128xf32> to vector<2x128xf32>
    %73 = arith.addf %71, %72 : vector<2x128xf32>
    %74 = arith.mulf %61, %73 : vector<2x128xf32>
    %75 = arith.addf %70, %74 : vector<2x128xf32>
    %76 = math.tanh %75 : vector<2x128xf32>
    %cst_27 = arith.constant 1.000000e+00 : f32
    %77 = vector.broadcast %cst_27 : f32 to vector<2x128xf32>
    %78 = arith.subf %77, %69 : vector<2x128xf32>
    %79 = arith.mulf %78, %76 : vector<2x128xf32>
    %80 = arith.mulf %69, %45 : vector<2x128xf32>
    %81 = arith.addf %79, %80 : vector<2x128xf32>
    %82 = vector.shape_cast %81 : vector<2x128xf32> to vector<1x2x128xf32>
    %83 = arith.index_cast %c1_i32 : i32 to index
    %c0_28 = arith.constant 0 : index
    %c0_29 = arith.constant 0 : index
    %84 = vector.load %arg6[%83, %c0_28, %c0_29] : memref<8x2x128xf32, #tpu.memory_space<vmem>>, vector<1x2x128xf32>
    tpu.vector_store %arg6[%83, %c0_28, %c0_29], %82 {strides = array<i32>} : memref<8x2x128xf32, #tpu.memory_space<vmem>>, vector<1x2x128xf32>,
    %c2_i32 = arith.constant 2 : i32
    %85 = arith.index_cast %c2_i32 : i32 to index
    %c0_30 = arith.constant 0 : index
    %c0_31 = arith.constant 0 : index
    %86 = vector.load %arg7[%85, %c0_30, %c0_31] : memref<8x2x384xf32, #tpu.memory_space<vmem>>, vector<1x2x384xf32>
    %87 = vector.shape_cast %86 : vector<1x2x384xf32> to vector<2x384xf32>
    %88 = arith.truncf %81 : vector<2x128xf32> to vector<2x128xbf16>
    %cst_32 = arith.constant dense<0.000000e+00> : vector<2x384xf32>
    %89 = tpu.matmul %88, %10, %cst_32 {dimension_numbers = #tpu.dot_dimension_numbers<[1], [0], [0], [1], [0, 0, 1, 1], [], []>} : vector<2x128xbf16>, vector<128x384xbf16>, vector<2x384xf32> -> vector<2x384xf32>
    %90 = vector.extract_strided_slice %87 {offsets = [0, 0], sizes = [2, 128], strides = [1, 1]} : vector<2x384xf32> to vector<2x128xf32>
    %91 = vector.extract_strided_slice %89 {offsets = [0, 0], sizes = [2, 128], strides = [1, 1]} : vector<2x384xf32> to vector<2x128xf32>
    %92 = arith.addf %90, %91 : vector<2x128xf32>
    %93 = arith.negf %92 : vector<2x128xf32>
    %94 = math.exp %93 : vector<2x128xf32>
    %cst_33 = arith.constant 1.000000e+00 : f32
    %95 = vector.broadcast %cst_33 : f32 to vector<2x128xf32>
    %96 = arith.addf %95, %94 : vector<2x128xf32>
    %97 = arith.divf %95, %96 : vector<2x128xf32>
    %98 = vector.extract_strided_slice %87 {offsets = [0, 128], sizes = [2, 128], strides = [1, 1]} : vector<2x384xf32> to vector<2x128xf32>
    %99 = vector.extract_strided_slice %89 {offsets = [0, 128], sizes = [2, 128], strides = [1, 1]} : vector<2x384xf32> to vector<2x128xf32>
    %100 = arith.addf %98, %99 : vector<2x128xf32>
    %101 = arith.negf %100 : vector<2x128xf32>
    %102 = math.exp %101 : vector<2x128xf32>
    %cst_34 = arith.constant 1.000000e+00 : f32
    %103 = vector.broadcast %cst_34 : f32 to vector<2x128xf32>
    %104 = arith.addf %103, %102 : vector<2x128xf32>
    %105 = arith.divf %103, %104 : vector<2x128xf32>
    %106 = vector.extract_strided_slice %87 {offsets = [0, 256], sizes = [2, 128], strides = [1, 1]} : vector<2x384xf32> to vector<2x128xf32>
    %107 = vector.extract_strided_slice %89 {offsets = [0, 256], sizes = [2, 128], strides = [1, 1]} : vector<2x384xf32> to vector<2x128xf32>
    %108 = vector.broadcast %11 : vector<1x128xf32> to vector<2x128xf32>
    %109 = arith.addf %107, %108 : vector<2x128xf32>
    %110 = arith.mulf %97, %109 : vector<2x128xf32>
    %111 = arith.addf %106, %110 : vector<2x128xf32>
    %112 = math.tanh %111 : vector<2x128xf32>
    %cst_35 = arith.constant 1.000000e+00 : f32
    %113 = vector.broadcast %cst_35 : f32 to vector<2x128xf32>
    %114 = arith.subf %113, %105 : vector<2x128xf32>
    %115 = arith.mulf %114, %112 : vector<2x128xf32>
    %116 = arith.mulf %105, %81 : vector<2x128xf32>
    %117 = arith.addf %115, %116 : vector<2x128xf32>
    %118 = vector.shape_cast %117 : vector<2x128xf32> to vector<1x2x128xf32>
    %119 = arith.index_cast %c2_i32 : i32 to index
    %c0_36 = arith.constant 0 : index
    %c0_37 = arith.constant 0 : index
    %120 = vector.load %arg6[%119, %c0_36, %c0_37] : memref<8x2x128xf32, #tpu.memory_space<vmem>>, vector<1x2x128xf32>
    tpu.vector_store %arg6[%119, %c0_36, %c0_37], %118 {strides = array<i32>} : memref<8x2x128xf32, #tpu.memory_space<vmem>>, vector<1x2x128xf32>,
    %c3_i32 = arith.constant 3 : i32
    %121 = arith.index_cast %c3_i32 : i32 to index
    %c0_38 = arith.constant 0 : index
    %c0_39 = arith.constant 0 : index
    %122 = vector.load %arg7[%121, %c0_38, %c0_39] : memref<8x2x384xf32, #tpu.memory_space<vmem>>, vector<1x2x384xf32>
    %123 = vector.shape_cast %122 : vector<1x2x384xf32> to vector<2x384xf32>
    %124 = arith.truncf %117 : vector<2x128xf32> to vector<2x128xbf16>
    %cst_40 = arith.constant dense<0.000000e+00> : vector<2x384xf32>
    %125 = tpu.matmul %124, %10, %cst_40 {dimension_numbers = #tpu.dot_dimension_numbers<[1], [0], [0], [1], [0, 0, 1, 1], [], []>} : vector<2x128xbf16>, vector<128x384xbf16>, vector<2x384xf32> -> vector<2x384xf32>
    %126 = vector.extract_strided_slice %123 {offsets = [0, 0], sizes = [2, 128], strides = [1, 1]} : vector<2x384xf32> to vector<2x128xf32>
    %127 = vector.extract_strided_slice %125 {offsets = [0, 0], sizes = [2, 128], strides = [1, 1]} : vector<2x384xf32> to vector<2x128xf32>
    %128 = arith.addf %126, %127 : vector<2x128xf32>
    %129 = arith.negf %128 : vector<2x128xf32>
    %130 = math.exp %129 : vector<2x128xf32>
    %cst_41 = arith.constant 1.000000e+00 : f32
    %131 = vector.broadcast %cst_41 : f32 to vector<2x128xf32>
    %132 = arith.addf %131, %130 : vector<2x128xf32>
    %133 = arith.divf %131, %132 : vector<2x128xf32>
    %134 = vector.extract_strided_slice %123 {offsets = [0, 128], sizes = [2, 128], strides = [1, 1]} : vector<2x384xf32> to vector<2x128xf32>
    %135 = vector.extract_strided_slice %125 {offsets = [0, 128], sizes = [2, 128], strides = [1, 1]} : vector<2x384xf32> to vector<2x128xf32>
    %136 = arith.addf %134, %135 : vector<2x128xf32>
    %137 = arith.negf %136 : vector<2x128xf32>
    %138 = math.exp %137 : vector<2x128xf32>
    %cst_42 = arith.constant 1.000000e+00 : f32
    %139 = vector.broadcast %cst_42 : f32 to vector<2x128xf32>
    %140 = arith.addf %139, %138 : vector<2x128xf32>
    %141 = arith.divf %139, %140 : vector<2x128xf32>
    %142 = vector.extract_strided_slice %123 {offsets = [0, 256], sizes = [2, 128], strides = [1, 1]} : vector<2x384xf32> to vector<2x128xf32>
    %143 = vector.extract_strided_slice %125 {offsets = [0, 256], sizes = [2, 128], strides = [1, 1]} : vector<2x384xf32> to vector<2x128xf32>
    %144 = vector.broadcast %11 : vector<1x128xf32> to vector<2x128xf32>
    %145 = arith.addf %143, %144 : vector<2x128xf32>
    %146 = arith.mulf %133, %145 : vector<2x128xf32>
    %147 = arith.addf %142, %146 : vector<2x128xf32>
    %148 = math.tanh %147 : vector<2x128xf32>
    %cst_43 = arith.constant 1.000000e+00 : f32
    %149 = vector.broadcast %cst_43 : f32 to vector<2x128xf32>
    %150 = arith.subf %149, %141 : vector<2x128xf32>
    %151 = arith.mulf %150, %148 : vector<2x128xf32>
    %152 = arith.mulf %141, %117 : vector<2x128xf32>
    %153 = arith.addf %151, %152 : vector<2x128xf32>
    %154 = vector.shape_cast %153 : vector<2x128xf32> to vector<1x2x128xf32>
    %155 = arith.index_cast %c3_i32 : i32 to index
    %c0_44 = arith.constant 0 : index
    %c0_45 = arith.constant 0 : index
    %156 = vector.load %arg6[%155, %c0_44, %c0_45] : memref<8x2x128xf32, #tpu.memory_space<vmem>>, vector<1x2x128xf32>
    tpu.vector_store %arg6[%155, %c0_44, %c0_45], %154 {strides = array<i32>} : memref<8x2x128xf32, #tpu.memory_space<vmem>>, vector<1x2x128xf32>,
    %c4_i32 = arith.constant 4 : i32
    %157 = arith.index_cast %c4_i32 : i32 to index
    %c0_46 = arith.constant 0 : index
    %c0_47 = arith.constant 0 : index
    %158 = vector.load %arg7[%157, %c0_46, %c0_47] : memref<8x2x384xf32, #tpu.memory_space<vmem>>, vector<1x2x384xf32>
    %159 = vector.shape_cast %158 : vector<1x2x384xf32> to vector<2x384xf32>
    %160 = arith.truncf %153 : vector<2x128xf32> to vector<2x128xbf16>
    %cst_48 = arith.constant dense<0.000000e+00> : vector<2x384xf32>
    %161 = tpu.matmul %160, %10, %cst_48 {dimension_numbers = #tpu.dot_dimension_numbers<[1], [0], [0], [1], [0, 0, 1, 1], [], []>} : vector<2x128xbf16>, vector<128x384xbf16>, vector<2x384xf32> -> vector<2x384xf32>
    %162 = vector.extract_strided_slice %159 {offsets = [0, 0], sizes = [2, 128], strides = [1, 1]} : vector<2x384xf32> to vector<2x128xf32>
    %163 = vector.extract_strided_slice %161 {offsets = [0, 0], sizes = [2, 128], strides = [1, 1]} : vector<2x384xf32> to vector<2x128xf32>
    %164 = arith.addf %162, %163 : vector<2x128xf32>
    %165 = arith.negf %164 : vector<2x128xf32>
    %166 = math.exp %165 : vector<2x128xf32>
    %cst_49 = arith.constant 1.000000e+00 : f32
    %167 = vector.broadcast %cst_49 : f32 to vector<2x128xf32>
    %168 = arith.addf %167, %166 : vector<2x128xf32>
    %169 = arith.divf %167, %168 : vector<2x128xf32>
    %170 = vector.extract_strided_slice %159 {offsets = [0, 128], sizes = [2, 128], strides = [1, 1]} : vector<2x384xf32> to vector<2x128xf32>
    %171 = vector.extract_strided_slice %161 {offsets = [0, 128], sizes = [2, 128], strides = [1, 1]} : vector<2x384xf32> to vector<2x128xf32>
    %172 = arith.addf %170, %171 : vector<2x128xf32>
    %173 = arith.negf %172 : vector<2x128xf32>
    %174 = math.exp %173 : vector<2x128xf32>
    %cst_50 = arith.constant 1.000000e+00 : f32
    %175 = vector.broadcast %cst_50 : f32 to vector<2x128xf32>
    %176 = arith.addf %175, %174 : vector<2x128xf32>
    %177 = arith.divf %175, %176 : vector<2x128xf32>
    %178 = vector.extract_strided_slice %159 {offsets = [0, 256], sizes = [2, 128], strides = [1, 1]} : vector<2x384xf32> to vector<2x128xf32>
    %179 = vector.extract_strided_slice %161 {offsets = [0, 256], sizes = [2, 128], strides = [1, 1]} : vector<2x384xf32> to vector<2x128xf32>
    %180 = vector.broadcast %11 : vector<1x128xf32> to vector<2x128xf32>
    %181 = arith.addf %179, %180 : vector<2x128xf32>
    %182 = arith.mulf %169, %181 : vector<2x128xf32>
    %183 = arith.addf %178, %182 : vector<2x128xf32>
    %184 = math.tanh %183 : vector<2x128xf32>
    %cst_51 = arith.constant 1.000000e+00 : f32
    %185 = vector.broadcast %cst_51 : f32 to vector<2x128xf32>
    %186 = arith.subf %185, %177 : vector<2x128xf32>
    %187 = arith.mulf %186, %184 : vector<2x128xf32>
    %188 = arith.mulf %177, %153 : vector<2x128xf32>
    %189 = arith.addf %187, %188 : vector<2x128xf32>
    %190 = vector.shape_cast %189 : vector<2x128xf32> to vector<1x2x128xf32>
    %191 = arith.index_cast %c4_i32 : i32 to index
    %c0_52 = arith.constant 0 : index
    %c0_53 = arith.constant 0 : index
    %192 = vector.load %arg6[%191, %c0_52, %c0_53] : memref<8x2x128xf32, #tpu.memory_space<vmem>>, vector<1x2x128xf32>
    tpu.vector_store %arg6[%191, %c0_52, %c0_53], %190 {strides = array<i32>} : memref<8x2x128xf32, #tpu.memory_space<vmem>>, vector<1x2x128xf32>,
    %c5_i32 = arith.constant 5 : i32
    %193 = arith.index_cast %c5_i32 : i32 to index
    %c0_54 = arith.constant 0 : index
    %c0_55 = arith.constant 0 : index
    %194 = vector.load %arg7[%193, %c0_54, %c0_55] : memref<8x2x384xf32, #tpu.memory_space<vmem>>, vector<1x2x384xf32>
    %195 = vector.shape_cast %194 : vector<1x2x384xf32> to vector<2x384xf32>
    %196 = arith.truncf %189 : vector<2x128xf32> to vector<2x128xbf16>
    %cst_56 = arith.constant dense<0.000000e+00> : vector<2x384xf32>
    %197 = tpu.matmul %196, %10, %cst_56 {dimension_numbers = #tpu.dot_dimension_numbers<[1], [0], [0], [1], [0, 0, 1, 1], [], []>} : vector<2x128xbf16>, vector<128x384xbf16>, vector<2x384xf32> -> vector<2x384xf32>
    %198 = vector.extract_strided_slice %195 {offsets = [0, 0], sizes = [2, 128], strides = [1, 1]} : vector<2x384xf32> to vector<2x128xf32>
    %199 = vector.extract_strided_slice %197 {offsets = [0, 0], sizes = [2, 128], strides = [1, 1]} : vector<2x384xf32> to vector<2x128xf32>
    %200 = arith.addf %198, %199 : vector<2x128xf32>
    %201 = arith.negf %200 : vector<2x128xf32>
    %202 = math.exp %201 : vector<2x128xf32>
    %cst_57 = arith.constant 1.000000e+00 : f32
    %203 = vector.broadcast %cst_57 : f32 to vector<2x128xf32>
    %204 = arith.addf %203, %202 : vector<2x128xf32>
    %205 = arith.divf %203, %204 : vector<2x128xf32>
    %206 = vector.extract_strided_slice %195 {offsets = [0, 128], sizes = [2, 128], strides = [1, 1]} : vector<2x384xf32> to vector<2x128xf32>
    %207 = vector.extract_strided_slice %197 {offsets = [0, 128], sizes = [2, 128], strides = [1, 1]} : vector<2x384xf32> to vector<2x128xf32>
    %208 = arith.addf %206, %207 : vector<2x128xf32>
    %209 = arith.negf %208 : vector<2x128xf32>
    %210 = math.exp %209 : vector<2x128xf32>
    %cst_58 = arith.constant 1.000000e+00 : f32
    %211 = vector.broadcast %cst_58 : f32 to vector<2x128xf32>
    %212 = arith.addf %211, %210 : vector<2x128xf32>
    %213 = arith.divf %211, %212 : vector<2x128xf32>
    %214 = vector.extract_strided_slice %195 {offsets = [0, 256], sizes = [2, 128], strides = [1, 1]} : vector<2x384xf32> to vector<2x128xf32>
    %215 = vector.extract_strided_slice %197 {offsets = [0, 256], sizes = [2, 128], strides = [1, 1]} : vector<2x384xf32> to vector<2x128xf32>
    %216 = vector.broadcast %11 : vector<1x128xf32> to vector<2x128xf32>
    %217 = arith.addf %215, %216 : vector<2x128xf32>
    %218 = arith.mulf %205, %217 : vector<2x128xf32>
    %219 = arith.addf %214, %218 : vector<2x128xf32>
    %220 = math.tanh %219 : vector<2x128xf32>
    %cst_59 = arith.constant 1.000000e+00 : f32
    %221 = vector.broadcast %cst_59 : f32 to vector<2x128xf32>
    %222 = arith.subf %221, %213 : vector<2x128xf32>
    %223 = arith.mulf %222, %220 : vector<2x128xf32>
    %224 = arith.mulf %213, %189 : vector<2x128xf32>
    %225 = arith.addf %223, %224 : vector<2x128xf32>
    %226 = vector.shape_cast %225 : vector<2x128xf32> to vector<1x2x128xf32>
    %227 = arith.index_cast %c5_i32 : i32 to index
    %c0_60 = arith.constant 0 : index
    %c0_61 = arith.constant 0 : index
    %228 = vector.load %arg6[%227, %c0_60, %c0_61] : memref<8x2x128xf32, #tpu.memory_space<vmem>>, vector<1x2x128xf32>
    tpu.vector_store %arg6[%227, %c0_60, %c0_61], %226 {strides = array<i32>} : memref<8x2x128xf32, #tpu.memory_space<vmem>>, vector<1x2x128xf32>,
    %c6_i32 = arith.constant 6 : i32
    %229 = arith.index_cast %c6_i32 : i32 to index
    %c0_62 = arith.constant 0 : index
    %c0_63 = arith.constant 0 : index
    %230 = vector.load %arg7[%229, %c0_62, %c0_63] : memref<8x2x384xf32, #tpu.memory_space<vmem>>, vector<1x2x384xf32>
    %231 = vector.shape_cast %230 : vector<1x2x384xf32> to vector<2x384xf32>
    %232 = arith.truncf %225 : vector<2x128xf32> to vector<2x128xbf16>
    %cst_64 = arith.constant dense<0.000000e+00> : vector<2x384xf32>
    %233 = tpu.matmul %232, %10, %cst_64 {dimension_numbers = #tpu.dot_dimension_numbers<[1], [0], [0], [1], [0, 0, 1, 1], [], []>} : vector<2x128xbf16>, vector<128x384xbf16>, vector<2x384xf32> -> vector<2x384xf32>
    %234 = vector.extract_strided_slice %231 {offsets = [0, 0], sizes = [2, 128], strides = [1, 1]} : vector<2x384xf32> to vector<2x128xf32>
    %235 = vector.extract_strided_slice %233 {offsets = [0, 0], sizes = [2, 128], strides = [1, 1]} : vector<2x384xf32> to vector<2x128xf32>
    %236 = arith.addf %234, %235 : vector<2x128xf32>
    %237 = arith.negf %236 : vector<2x128xf32>
    %238 = math.exp %237 : vector<2x128xf32>
    %cst_65 = arith.constant 1.000000e+00 : f32
    %239 = vector.broadcast %cst_65 : f32 to vector<2x128xf32>
    %240 = arith.addf %239, %238 : vector<2x128xf32>
    %241 = arith.divf %239, %240 : vector<2x128xf32>
    %242 = vector.extract_strided_slice %231 {offsets = [0, 128], sizes = [2, 128], strides = [1, 1]} : vector<2x384xf32> to vector<2x128xf32>
    %243 = vector.extract_strided_slice %233 {offsets = [0, 128], sizes = [2, 128], strides = [1, 1]} : vector<2x384xf32> to vector<2x128xf32>
    %244 = arith.addf %242, %243 : vector<2x128xf32>
    %245 = arith.negf %244 : vector<2x128xf32>
    %246 = math.exp %245 : vector<2x128xf32>
    %cst_66 = arith.constant 1.000000e+00 : f32
    %247 = vector.broadcast %cst_66 : f32 to vector<2x128xf32>
    %248 = arith.addf %247, %246 : vector<2x128xf32>
    %249 = arith.divf %247, %248 : vector<2x128xf32>
    %250 = vector.extract_strided_slice %231 {offsets = [0, 256], sizes = [2, 128], strides = [1, 1]} : vector<2x384xf32> to vector<2x128xf32>
    %251 = vector.extract_strided_slice %233 {offsets = [0, 256], sizes = [2, 128], strides = [1, 1]} : vector<2x384xf32> to vector<2x128xf32>
    %252 = vector.broadcast %11 : vector<1x128xf32> to vector<2x128xf32>
    %253 = arith.addf %251, %252 : vector<2x128xf32>
    %254 = arith.mulf %241, %253 : vector<2x128xf32>
    %255 = arith.addf %250, %254 : vector<2x128xf32>
    %256 = math.tanh %255 : vector<2x128xf32>
    %cst_67 = arith.constant 1.000000e+00 : f32
    %257 = vector.broadcast %cst_67 : f32 to vector<2x128xf32>
    %258 = arith.subf %257, %249 : vector<2x128xf32>
    %259 = arith.mulf %258, %256 : vector<2x128xf32>
    %260 = arith.mulf %249, %225 : vector<2x128xf32>
    %261 = arith.addf %259, %260 : vector<2x128xf32>
    %262 = vector.shape_cast %261 : vector<2x128xf32> to vector<1x2x128xf32>
    %263 = arith.index_cast %c6_i32 : i32 to index
    %c0_68 = arith.constant 0 : index
    %c0_69 = arith.constant 0 : index
    %264 = vector.load %arg6[%263, %c0_68, %c0_69] : memref<8x2x128xf32, #tpu.memory_space<vmem>>, vector<1x2x128xf32>
    tpu.vector_store %arg6[%263, %c0_68, %c0_69], %262 {strides = array<i32>} : memref<8x2x128xf32, #tpu.memory_space<vmem>>, vector<1x2x128xf32>,
    %c7_i32 = arith.constant 7 : i32
    %265 = arith.index_cast %c7_i32 : i32 to index
    %c0_70 = arith.constant 0 : index
    %c0_71 = arith.constant 0 : index
    %266 = vector.load %arg7[%265, %c0_70, %c0_71] : memref<8x2x384xf32, #tpu.memory_space<vmem>>, vector<1x2x384xf32>
    %267 = vector.shape_cast %266 : vector<1x2x384xf32> to vector<2x384xf32>
    %268 = arith.truncf %261 : vector<2x128xf32> to vector<2x128xbf16>
    %cst_72 = arith.constant dense<0.000000e+00> : vector<2x384xf32>
    %269 = tpu.matmul %268, %10, %cst_72 {dimension_numbers = #tpu.dot_dimension_numbers<[1], [0], [0], [1], [0, 0, 1, 1], [], []>} : vector<2x128xbf16>, vector<128x384xbf16>, vector<2x384xf32> -> vector<2x384xf32>
    %270 = vector.extract_strided_slice %267 {offsets = [0, 0], sizes = [2, 128], strides = [1, 1]} : vector<2x384xf32> to vector<2x128xf32>
    %271 = vector.extract_strided_slice %269 {offsets = [0, 0], sizes = [2, 128], strides = [1, 1]} : vector<2x384xf32> to vector<2x128xf32>
    %272 = arith.addf %270, %271 : vector<2x128xf32>
    %273 = arith.negf %272 : vector<2x128xf32>
    %274 = math.exp %273 : vector<2x128xf32>
    %cst_73 = arith.constant 1.000000e+00 : f32
    %275 = vector.broadcast %cst_73 : f32 to vector<2x128xf32>
    %276 = arith.addf %275, %274 : vector<2x128xf32>
    %277 = arith.divf %275, %276 : vector<2x128xf32>
    %278 = vector.extract_strided_slice %267 {offsets = [0, 128], sizes = [2, 128], strides = [1, 1]} : vector<2x384xf32> to vector<2x128xf32>
    %279 = vector.extract_strided_slice %269 {offsets = [0, 128], sizes = [2, 128], strides = [1, 1]} : vector<2x384xf32> to vector<2x128xf32>
    %280 = arith.addf %278, %279 : vector<2x128xf32>
    %281 = arith.negf %280 : vector<2x128xf32>
    %282 = math.exp %281 : vector<2x128xf32>
    %cst_74 = arith.constant 1.000000e+00 : f32
    %283 = vector.broadcast %cst_74 : f32 to vector<2x128xf32>
    %284 = arith.addf %283, %282 : vector<2x128xf32>
    %285 = arith.divf %283, %284 : vector<2x128xf32>
    %286 = vector.extract_strided_slice %267 {offsets = [0, 256], sizes = [2, 128], strides = [1, 1]} : vector<2x384xf32> to vector<2x128xf32>
    %287 = vector.extract_strided_slice %269 {offsets = [0, 256], sizes = [2, 128], strides = [1, 1]} : vector<2x384xf32> to vector<2x128xf32>
    %288 = vector.broadcast %11 : vector<1x128xf32> to vector<2x128xf32>
    %289 = arith.addf %287, %288 : vector<2x128xf32>
    %290 = arith.mulf %277, %289 : vector<2x128xf32>
    %291 = arith.addf %286, %290 : vector<2x128xf32>
    %292 = math.tanh %291 : vector<2x128xf32>
    %cst_75 = arith.constant 1.000000e+00 : f32
    %293 = vector.broadcast %cst_75 : f32 to vector<2x128xf32>
    %294 = arith.subf %293, %285 : vector<2x128xf32>
    %295 = arith.mulf %294, %292 : vector<2x128xf32>
    %296 = arith.mulf %285, %261 : vector<2x128xf32>
    %297 = arith.addf %295, %296 : vector<2x128xf32>
    %298 = vector.shape_cast %297 : vector<2x128xf32> to vector<1x2x128xf32>
    %299 = arith.index_cast %c7_i32 : i32 to index
    %c0_76 = arith.constant 0 : index
    %c0_77 = arith.constant 0 : index
    %300 = vector.load %arg6[%299, %c0_76, %c0_77] : memref<8x2x128xf32, #tpu.memory_space<vmem>>, vector<1x2x128xf32>
    tpu.vector_store %arg6[%299, %c0_76, %c0_77], %298 {strides = array<i32>} : memref<8x2x128xf32, #tpu.memory_space<vmem>>, vector<1x2x128xf32>,
    %c8_i32 = arith.constant 8 : i32
    return
  }
  func.func @transform_0(%arg0: i32) -> (i32, i32, i32) {
    %c0_i32 = arith.constant 0 : i32
    %c0_i32_0 = arith.constant 0 : i32
    %c0_i32_1 = arith.constant 0 : i32
    return %c0_i32, %arg0, %c0_i32_0 : i32, i32, i32
  }
  func.func @transform_1(%arg0: i32) -> (i32, i32) {
    %c0_i32 = arith.constant 0 : i32
    %c0_i32_0 = arith.constant 0 : i32
    %c0_i32_1 = arith.constant 0 : i32
    return %c0_i32, %c0_i32_0 : i32, i32
  }
  func.func @transform_2(%arg0: i32) -> (i32, i32) {
    %c0_i32 = arith.constant 0 : i32
    %c0_i32_0 = arith.constant 0 : i32
    %c0_i32_1 = arith.constant 0 : i32
    return %c0_i32, %c0_i32_0 : i32, i32
  }
  func.func @transform_3(%arg0: i32) -> (i32, i32) {
    %c0_i32 = arith.constant 0 : i32
    %c0_i32_0 = arith.constant 0 : i32
    %c0_i32_1 = arith.constant 0 : i32
    return %c0_i32, %c0_i32_0 : i32, i32
  }
  func.func @transform_4(%arg0: i32) -> (i32, i32) {
    %c0_i32 = arith.constant 0 : i32
    %c0_i32_0 = arith.constant 0 : i32
    %c0_i32_1 = arith.constant 0 : i32
    return %c0_i32, %c0_i32_0 : i32, i32
  }
  func.func @transform_5(%arg0: i32) -> (i32, i32, i32) {
    %c0_i32 = arith.constant 0 : i32
    %c0_i32_0 = arith.constant 0 : i32
    %c0_i32_1 = arith.constant 0 : i32
    return %c0_i32, %arg0, %c0_i32_0 : i32, i32, i32
  }
}

module attributes {stable_mosaic.version = 11 : i64} {
  func.func @_linear_kernel(%arg0: i32, %arg1: memref<16x128xf32, #tpu.memory_space<vmem>>, %arg2: memref<128x128xbf16, #tpu.memory_space<vmem>>, %arg3: memref<1x128xf32, #tpu.memory_space<vmem>>, %arg4: memref<16x128xf32, #tpu.memory_space<vmem>>) attributes {dimension_semantics = [#tpu.dimension_semantics<parallel>], iteration_bounds = array<i64: 1>, scalar_prefetch = 0 : i64, scratch_operands = 0 : i64, tpu.core_type = #tpu.core_type<tc>, window_params = [{transform_indices = @transform_0, window_bounds = array<i64: 16, 128>}, {pipeline_mode = #tpu.pipeline_mode<synchronous>, transform_indices = @transform_1, window_bounds = array<i64: 128, 128>}, {pipeline_mode = #tpu.pipeline_mode<synchronous>, transform_indices = @transform_2, window_bounds = array<i64: 1, 128>}, {transform_indices = @transform_3, window_bounds = array<i64: 16, 128>}]} {
    %c0 = arith.constant 0 : index
    %c0_0 = arith.constant 0 : index
    %0 = vector.load %arg1[%c0, %c0_0] : memref<16x128xf32, #tpu.memory_space<vmem>>, vector<16x128xf32>
    %1 = arith.truncf %0 : vector<16x128xf32> to vector<16x128xbf16>
    %c0_1 = arith.constant 0 : index
    %c0_2 = arith.constant 0 : index
    %2 = vector.load %arg2[%c0_1, %c0_2] : memref<128x128xbf16, #tpu.memory_space<vmem>>, vector<128x128xbf16>
    %cst = arith.constant dense<0.000000e+00> : vector<16x128xf32>
    %3 = tpu.matmul %1, %2, %cst {dimension_numbers = #tpu.dot_dimension_numbers<[1], [0], [0], [1], [0, 0, 1, 1], [], []>} : vector<16x128xbf16>, vector<128x128xbf16>, vector<16x128xf32> -> vector<16x128xf32>
    %c0_3 = arith.constant 0 : index
    %c0_4 = arith.constant 0 : index
    %4 = vector.load %arg3[%c0_3, %c0_4] : memref<1x128xf32, #tpu.memory_space<vmem>>, vector<1x128xf32>
    %5 = vector.broadcast %4 : vector<1x128xf32> to vector<16x128xf32>
    %6 = arith.addf %3, %5 : vector<16x128xf32>
    %c0_5 = arith.constant 0 : index
    %c0_6 = arith.constant 0 : index
    %7 = vector.load %arg4[%c0_5, %c0_6] : memref<16x128xf32, #tpu.memory_space<vmem>>, vector<16x128xf32>
    tpu.vector_store %arg4[%c0_5, %c0_6], %6 {strides = array<i32>} : memref<16x128xf32, #tpu.memory_space<vmem>>, vector<16x128xf32>,
    return
  }
  func.func @transform_0(%arg0: i32) -> (i32, i32) {
    %c0_i32 = arith.constant 0 : i32
    %c0_i32_0 = arith.constant 0 : i32
    return %arg0, %c0_i32 : i32, i32
  }
  func.func @transform_1(%arg0: i32) -> (i32, i32) {
    %c0_i32 = arith.constant 0 : i32
    %c0_i32_0 = arith.constant 0 : i32
    %c0_i32_1 = arith.constant 0 : i32
    return %c0_i32, %c0_i32_0 : i32, i32
  }
  func.func @transform_2(%arg0: i32) -> (i32, i32) {
    %c0_i32 = arith.constant 0 : i32
    %c0_i32_0 = arith.constant 0 : i32
    %c0_i32_1 = arith.constant 0 : i32
    return %c0_i32, %c0_i32_0 : i32, i32
  }
  func.func @transform_3(%arg0: i32) -> (i32, i32) {
    %c0_i32 = arith.constant 0 : i32
    %c0_i32_0 = arith.constant 0 : i32
    return %arg0, %c0_i32 : i32, i32
  }
}

</mosaic_0001>

<bundles_post_ra>
// kernel: rnn_forward.8
= control target key start
LH: loop header
LB: loop body
LE: loop exit
PB: predicated region body
PF: predicated region fallthrough
CT: control target
= control target key end

     0   :  { %v76_v0 = vmov 0.0   ;;  %s120_s0 = inlined_call_operand.vmem [shape: f32[16,128], index: 0, kind: input, shape index: {}]   ;;  %s121_s1 = inlined_call_operand.vmem [shape: f32[1,128], index: 1, kind: input, shape index: {}]   ;;  %s122_s2 = inlined_call_operand.vmem [shape: f32[1,128], index: 2, kind: input, shape index: {}]   ;;  %s123_s3 = inlined_call_operand.vmem [shape: f32[1,128], index: 3, kind: output, shape index: {0}]   ;;  %s124_s4 = inlined_call_operand.vmem [shape: f32[1,128], index: 4, kind: output, shape index: {1}]  }
   0x1   :  { %20 = vst [vmem:[#allocation2] sm:$0x1] %v76_v0  ;;  %21 = vst [vmem:[#allocation3] sm:$0x1] %v76_v0  ;;  %v22_v1 = vld [vmem:[%s120_s0] sm:$0xff]  ;;  %v23_v2 = vld [vmem:[%s120_s0 + $0x8] sm:$0xff] }
   0x2   :  { %v25_v3 = vadd.f32 %v23_v2, %v22_v1  ;;  %v35_v4 = vmul.f32 %v22_v1, %v22_v1  ;;  %v36_v5 = vmul.f32 %v23_v2, %v23_v2  ;;  %v56_v31 = vld [vmem:[%s121_s1] sm:$0x1] }
   0x3   :  { %v61_v34 = vld [vmem:[%s122_s2] sm:$0x1] }
   0x4   :  { %v26_v6 = vrot.slane %v25_v3, 4  ;;  %v37_v7 = vadd.f32 %v36_v5, %v35_v4 }
   0x6   :  { %v27_v8 = vadd.f32 %v26_v6, %v25_v3  ;;  %v38_v9 = vrot.slane %v37_v7, 4 }
   0x8   :  { %v28_v10 = vrot.slane %v27_v8, 2  ;;  %v39_v11 = vadd.f32 %v38_v9, %v37_v7  ;;  %v24_v16 = vld [vmem:[#allocation2] sm:$0x1]  ;;  %v34_v19 = vld [vmem:[#allocation3] sm:$0x1] }
   0xa   :  { %v29_v12 = vadd.f32 %v28_v10, %v27_v8  ;;  %v40_v13 = vrot.slane %v39_v11, 2 }
   0xc   :  { %v30_v14 = vrot.slane %v29_v12, 1  ;;  %v41_v15 = vadd.f32 %v40_v13, %v39_v11 }
   0xe   :  { %v31_v17 = vadd.f32 %v30_v14, %v29_v12  ;;  %v42_v18 = vrot.slane %v41_v15, 1 }
  0x10   :  { %v32_v20 = vadd.f32 %v31_v17, %v24_v16  ;;  %v43_v21 = vadd.f32 %v42_v18, %v41_v15 }
  0x12   :  { %33 = vst [vmem:[#allocation2] sm:$0x1] %v32_v20  ;;  %v44_v22 = vadd.f32 %v43_v21, %v34_v19 }
  0x14   :  { %45 = vst [vmem:[#allocation3] sm:$0x1] %v44_v22 }
  0x19   :  { %v49_v23 = vld [vmem:[#allocation2] sm:$0x1] }
  0x1a   :  { %v50_v24 = vmul.f32 0.0625, %v49_v23 }
  0x1b   :  { %v51_v25 = vld [vmem:[#allocation3] sm:$0x1] }
  0x1c   :  { %v52_v26 = vmul.f32 0.0625, %v51_v25  ;;  %v53_v27 = vmul.f32 %v50_v24, %v50_v24 }
  0x1e   :  { %v54_v28 = vsub.f32 %v52_v26, %v53_v27 }
  0x20   :  { %v55_v29 = vmax.f32 %v54_v28, 0.0 }
  0x22   :  { %v57_v30 = vadd.f32 1e-05, %v55_v29 }
  0x24   :  { %74 = vrsqrt.f32 %v57_v30 }
  0x2e   :  { %v75_v32 = vpop.eup %74 }
  0x2f   :  { %v59_v33 = vmul.f32 %v75_v32, %v56_v31 }
  0x31   :  { %60 = vst [vmem:[%s123_s3] sm:$0x1] %v59_v33  ;;  %v62_v35 = vmul.f32 %v59_v33, %v50_v24 }
  0x33   :  { %v63_v36 = vsub.f32 %v61_v34, %v62_v35 }
  0x35   :  { %64 = vst [vmem:[%s124_s4] sm:$0x1] %v63_v36 }

// kernel: rnn_forward.15
= control target key start
LH: loop header
LB: loop body
LE: loop exit
PB: predicated region body
PF: predicated region fallthrough
CT: control target
= control target key end

     0   :  { %v184_v0 = vmov 0.0   ;;  %vm185_vm0 = vmmov 0   ;;  %s245_s1 = inlined_call_operand.vmem [shape: bf16[128,128], index: 1, kind: input, shape index: {}]   ;;  %s246_s0 = inlined_call_operand.vmem [shape: f32[16,128], index: 0, kind: input, shape index: {}]   ;;  %s247_s2 = inlined_call_operand.vmem [shape: f32[1,128], index: 2, kind: input, shape index: {}]   ;;  %s248_s3 = inlined_call_operand.vmem [shape: f32[16,128], index: 3, kind: output, shape index: {}]  }
   0x1   :  { %154 = vmatprep.subr.bf16.mxu0 %v184_v0  ;;  %v176_v1 = vld [vmem:[%s245_s1] sm:$0xff]   ;;  %170 = vmatprep.mubr.msk.bf16.mxu0 %vm185_vm0, %v184_v0  ;;  %v177_v2 = vld [vmem:[%s245_s1 + $0x8] sm:$0xff]   ;;  %v178_v3 = vld [vmem:[%s245_s1 + $0x10] sm:$0xff]  }
   0x2   :  { %155 = vmatpush3.bf16.msra.mxu0 %v176_v1  ;;  %v179_v4 = vld [vmem:[%s245_s1 + $0x18] sm:$0xff]   ;;  %v180_v5 = vld [vmem:[%s245_s1 + $0x20] sm:$0xff]   ;;  %v181_v6 = vld [vmem:[%s245_s1 + $0x28] sm:$0xff]  }
   0x3   :  { %156 = vmatprep.subr.bf16.mxu0 %v184_v0  ;;  %v182_v7 = vld [vmem:[%s245_s1 + $0x30] sm:$0xff]   ;;  %v183_v8 = vld [vmem:[%s245_s1 + $0x38] sm:$0xff]   ;;  %v15_v9 = vld [vmem:[%s246_s0] sm:$0xff] }
   0x4   :  { %v16_v10 = vld [vmem:[%s246_s0 + $0x8] sm:$0xff]  ;;  %v136_v12 = vld [vmem:[%s247_s2] ss:$0 sm:$0xff] }
   0x5   :  { %v17_v11 = vpack.c.bf16 %v16_v10, %v15_v9 }
   0x6   :  { %157 = vmatpush3.bf16.msra.mxu0 %v177_v2 }
   0x7   :  { %158 = vmatprep.subr.bf16.mxu0 %v184_v0 }
   0xa   :  { %159 = vmatpush3.bf16.msra.mxu0 %v178_v3 }
   0xb   :  { %160 = vmatprep.subr.bf16.mxu0 %v184_v0 }
   0xe   :  { %161 = vmatpush3.bf16.msra.mxu0 %v179_v4 }
   0xf   :  { %162 = vmatprep.subr.bf16.mxu0 %v184_v0 }
  0x12   :  { %163 = vmatpush3.bf16.msra.mxu0 %v180_v5 }
  0x13   :  { %164 = vmatprep.subr.bf16.mxu0 %v184_v0 }
  0x16   :  { %165 = vmatpush3.bf16.msra.mxu0 %v181_v6 }
  0x17   :  { %166 = vmatprep.subr.bf16.mxu0 %v184_v0 }
  0x1a   :  { %167 = vmatpush3.bf16.msra.mxu0 %v182_v7 }
  0x1b   :  { %168 = vmatprep.subr.bf16.mxu0 %v184_v0 }
  0x1e   :  { %169 = vmatpush3.bf16.msra.mxu0 %v183_v8 }
  0x21   :  { %171 = vmatmul.mubr.bf16.vlgmr.msra.gmra.mrb[0].mxu0 %v17_v11 }
  0xf4   :  { %v123_v13 = vpop.f32.mrb[0].mxu0 }
  0xf5   :  { %v124_v14 = vadd.f32 %v136_v12, %v123_v13  ;;  %v172_v15 = vpop.f32.mrb[1].mxu0 }
  0xf6   :  { %v126_v16 = vpop.f32.mrb[2].mxu0 }
  0xf7   :  { %130 = vst [vmem:[%s248_s3] sm:$0xff] %v124_v14  ;;  %v127_v17 = vadd.f32 %v136_v12, %v126_v16  ;;  %v173_v18 = vpop.f32.mrb[3].mxu0 }
  0xf9   :  { %131 = vst [vmem:[%s248_s3 + $0x8] sm:$0xff] %v127_v17 }

// kernel: rnn_forward.9
= control target key start
LH: loop header
LB: loop body
LE: loop exit
PB: predicated region body
PF: predicated region fallthrough
CT: control target
= control target key end

     0   :  { %v2004_v1 = vmov 0.0   ;;  %v2005_v2 = vmov 0   ;;  %vm2006_vm0 = vmmov 0   ;;  %v2007_v12 = vmov 1983009808   ;;  %s2691_s1 = inlined_call_operand.vmem [shape: bf16[128,384], index: 1, kind: input, shape index: {}]   ;;  %s2692_s0 = inlined_call_operand.vmem [shape: f32[8,2,128], index: 0, kind: input, shape index: {}]   ;;  %s2693_s3 = inlined_call_operand.vmem [shape: bf16[128,384], index: 3, kind: input, shape index: {}]   ;;  %s2694_s2 = inlined_call_operand.vmem [shape: f32[1,384], index: 2, kind: input, shape index: {}]   ;;  %s2695_s4 = inlined_call_operand.vmem [shape: f32[1,128], index: 4, kind: input, shape index: {}]   ;;  %s2696_s5 = inlined_call_operand.vmem [shape: f32[8,2,128], index: 5, kind: output, shape index: {}]  }
   0x1   :  { %v1836_v0 = vld [vmem:[%s2691_s1 + $0x4] ss:$12 sps:$4 sm:$0xff]   ;;  %1652 = vmatprep.subr.bf16.mxu1 %v2004_v1  ;;  %283 = vmatprep.mubr.bf16.mxu0 %v2005_v2  ;;  %v1838_v3 = vld [vmem:[%s2691_s1] ss:$12 sps:$4 sm:$0xff]   ;;  %v1839_v4 = vld [vmem:[%s2691_s1 + $0x8] ss:$12 sps:$4 sm:$0xff]   ;;  %v40_v13 = vunpack.c.l.s4 %v2007_v12  ;;  %v42_v14 = vlaneseq }
   0x2   :  { %1668 = vmatprep.mubr.msk.bf16.mxu1 %vm2006_vm0, %v2004_v1  ;;  %251 = vmatprep.subr.bf16.mxu0 %v1836_v0  ;;  %v1840_v5 = vld [vmem:[%s2691_s1 + $0x1c] ss:$12 sps:$4 sm:$0xff]   ;;  %v1842_v6 = vld [vmem:[%s2691_s1 + $0x18] ss:$12 sps:$4 sm:$0xff]   ;;  %v1843_v7 = vld [vmem:[%s2691_s1 + $0x20] ss:$12 sps:$4 sm:$0xff]  }
   0x3   :  { %252 = vmatpush1.bf16.msra.mxu0 %v1838_v3  ;;  %1653 = vmatpush3.bf16.msra.mxu1 %v1839_v4  ;;  %v1844_v8 = vld [vmem:[%s2691_s1 + $0x34] ss:$12 sps:$4 sm:$0xff]   ;;  %v1846_v9 = vld [vmem:[%s2691_s1 + $0x30] ss:$12 sps:$4 sm:$0xff]   ;;  %v1847_v10 = vld [vmem:[%s2691_s1 + $0x38] ss:$12 sps:$4 sm:$0xff]   ;;  %v41_v19 = vunpack.c.0.s8 %v40_v13 }
   0x4   :  { %253 = vmatprep.subr.bf16.mxu0 %v1840_v5  ;;  %1654 = vmatprep.subr.bf16.mxu1 %v2004_v1  ;;  %v1848_v11 = vld [vmem:[%s2691_s1 + $0x4c] ss:$12 sps:$4 sm:$0xff]   ;;  %v1850_v15 = vld [vmem:[%s2691_s1 + $0x48] ss:$12 sps:$4 sm:$0xff]   ;;  %v1851_v16 = vld [vmem:[%s2691_s1 + $0x50] ss:$12 sps:$4 sm:$0xff]  }
   0x5   :  { %v1852_v17 = vld [vmem:[%s2691_s1 + $0x64] ss:$12 sps:$4 sm:$0xff]   ;;  %v1854_v18 = vld [vmem:[%s2691_s1 + $0x60] ss:$12 sps:$4 sm:$0xff]   ;;  %v2087_v20 = vshrl.u32 %v42_v14, 7 }
   0x6   :  { %v1855_v21 = vld [vmem:[%s2691_s1 + $0x68] ss:$12 sps:$4 sm:$0xff]   ;;  %v1858_v23 = vld [vmem:[%s2691_s1 + $0x78] ss:$12 sps:$4 sm:$0xff]   ;;  %v1859_v24 = vld [vmem:[%s2691_s1 + $0x80] ss:$12 sps:$4 sm:$0xff]  }
   0x7   :  { %254 = vmatpush1.bf16.msra.mxu0 %v1842_v6  ;;  %1655 = vmatpush3.bf16.msra.mxu1 %v1843_v7  ;;  %v1856_v22 = vld [vmem:[%s2691_s1 + $0x7c] ss:$12 sps:$4 sm:$0xff]   ;;  %v1860_v25 = vld [vmem:[%s2691_s1 + $0x94] ss:$12 sps:$4 sm:$0xff]   ;;  %v2109_v27 = vsub.s32 %v41_v19, %v2087_v20  ;;  %v23_v29 = vld [vmem:[%s2692_s0 + $0x4] sm:$0x3] }
   0x8   :  { %255 = vmatprep.subr.bf16.mxu0 %v1844_v8  ;;  %1656 = vmatprep.subr.bf16.mxu1 %v2004_v1  ;;  %v21_v26 = vld [vmem:[%s2692_s0] sm:$0x3]  ;;  %v22_v28 = vld [vmem:[%s2692_s0 + $0x2] sm:$0x3]  ;;  %v24_v30 = vld [vmem:[%s2692_s0 + $0x6] sm:$0x3] }
   0x9   :  { %v25_v31 = vld [vmem:[%s2692_s0 + $0x8] sm:$0x3]  ;;  %v26_v32 = vld [vmem:[%s2692_s0 + $0xa] sm:$0x3]  ;;  %v27_v33 = vld [vmem:[%s2692_s0 + $0xc] sm:$0x3]  ;;  %v37_v34 = vcombine.low %v21_v26, %v22_v28  ;;  %v38_v35 = vcombine.low %v23_v29, %v24_v30 }
   0xa   :  { %v28_v36 = vld [vmem:[%s2692_s0 + $0xe] sm:$0x3]  ;;  %v54_v37 = vcombine.low %v25_v31, %v26_v32  ;;  %v1862_v41 = vld [vmem:[%s2691_s1 + $0x90] ss:$12 sps:$4 sm:$0xff]   ;;  %v1863_v42 = vld [vmem:[%s2691_s1 + $0x98] ss:$12 sps:$4 sm:$0xff]  }
   0xb   :  { %256 = vmatpush1.bf16.msra.mxu0 %v1846_v9  ;;  %1657 = vmatpush3.bf16.msra.mxu1 %v1847_v10  ;;  %v45_v38 = vrot.slane %v37_v34, %v2109_v27  ;;  %v52_v39 = vrot.slane %v38_v35, %v2109_v27  ;;  %v55_v40 = vcombine.low %v27_v33, %v28_v36  ;;  %v1864_v44 = vld [vmem:[%s2691_s1 + $0xac] ss:$12 sps:$4 sm:$0xff]   ;;  %v1866_v48 = vld [vmem:[%s2691_s1 + $0xa8] ss:$12 sps:$4 sm:$0xff]   ;;  %v1867_v49 = vld [vmem:[%s2691_s1 + $0xb0] ss:$12 sps:$4 sm:$0xff]  }
   0xc   :  { %257 = vmatprep.subr.bf16.mxu0 %v1848_v11  ;;  %1658 = vmatprep.subr.bf16.mxu1 %v2004_v1  ;;  %v62_v43 = vrot.slane %v54_v37, %v2109_v27  ;;  %v2156_v50 = vld [vmem:[%s2693_s3 + $0x4] ss:$12 sps:$4 sm:$0xff]   ;;  %v2162_v52 = vld [vmem:[%s2693_s3] ss:$12 sps:$4 sm:$0xff]   ;;  %v2167_v53 = vld [vmem:[%s2693_s3 + $0x1c] ss:$12 sps:$4 sm:$0xff]  }
   0xd   :  { %v69_v45 = vrot.slane %v55_v40, %v2109_v27  ;;  %v53_v46 = vcombine.low %v45_v38, %v52_v39  ;;  %v2173_v54 = vld [vmem:[%s2693_s3 + $0x8] ss:$12 sps:$4 sm:$0xff]   ;;  %v2179_v55 = vld [vmem:[%s2693_s3 + $0x18] ss:$12 sps:$4 sm:$0xff]   ;;  %v2192_v57 = vld [vmem:[%s2693_s3 + $0x20] ss:$12 sps:$4 sm:$0xff]  }
   0xe   :  { %v2185_v56 = vld [vmem:[%s2693_s3 + $0x34] ss:$12 sps:$4 sm:$0xff]   ;;  %v2202_v58 = vld [vmem:[%s2693_s3 + $0x30] ss:$12 sps:$4 sm:$0xff]   ;;  %v2208_v59 = vld [vmem:[%s2693_s3 + $0x4c] ss:$12 sps:$4 sm:$0xff]  }
   0xf   :  { %258 = vmatpush1.bf16.msra.mxu0 %v1850_v15  ;;  %1659 = vmatpush3.bf16.msra.mxu1 %v1851_v16  ;;  %v70_v47 = vcombine.low %v62_v43, %v69_v45  ;;  %v2214_v60 = vld [vmem:[%s2693_s3 + $0x38] ss:$12 sps:$4 sm:$0xff]   ;;  %v2221_v61 = vld [vmem:[%s2693_s3 + $0x48] ss:$12 sps:$4 sm:$0xff]   ;;  %v2233_v63 = vld [vmem:[%s2693_s3 + $0x50] ss:$12 sps:$4 sm:$0xff]  }
  0x10   :  { %259 = vmatprep.subr.bf16.mxu0 %v1852_v17  ;;  %1660 = vmatprep.subr.bf16.mxu1 %v2004_v1  ;;  %v2227_v62 = vld [vmem:[%s2693_s3 + $0x64] ss:$12 sps:$4 sm:$0xff]   ;;  %v2240_v0 = vld [vmem:[%s2693_s3 + $0x60] ss:$12 sps:$4 sm:$0xff]   ;;  %v2246_v3 = vld [vmem:[%s2693_s3 + $0x7c] ss:$12 sps:$4 sm:$0xff]  }
  0x11   :  { %v73_v51 = vpack.c.bf16 %v70_v47, %v53_v46  ;;  %v2252_v4 = vld [vmem:[%s2693_s3 + $0x68] ss:$12 sps:$4 sm:$0xff]   ;;  %v2259_v5 = vld [vmem:[%s2693_s3 + $0x78] ss:$12 sps:$4 sm:$0xff]   ;;  %v2271_v7 = vld [vmem:[%s2693_s3 + $0x80] ss:$12 sps:$4 sm:$0xff]  }
  0x12   :  { %v2265_v6 = vld [vmem:[%s2693_s3 + $0x94] ss:$12 sps:$4 sm:$0xff]   ;;  %v2278_v8 = vld [vmem:[%s2693_s3 + $0x90] ss:$12 sps:$4 sm:$0xff]   ;;  %v2284_v9 = vld [vmem:[%s2693_s3 + $0xac] ss:$12 sps:$4 sm:$0xff]  }
  0x13   :  { %260 = vmatpush1.bf16.msra.mxu0 %v1854_v18  ;;  %1661 = vmatpush3.bf16.msra.mxu1 %v1855_v21  ;;  %v2290_v10 = vld [vmem:[%s2693_s3 + $0x98] ss:$12 sps:$4 sm:$0xff]   ;;  %v2297_v11 = vld [vmem:[%s2693_s3 + $0xa8] ss:$12 sps:$4 sm:$0xff]   ;;  %v2304_v12 = vld [vmem:[%s2693_s3 + $0xb0] ss:$12 sps:$4 sm:$0xff]  }
  0x14   :  { %261 = vmatprep.subr.bf16.mxu0 %v1856_v22  ;;  %1662 = vmatprep.subr.bf16.mxu1 %v2004_v1  ;;  %v110_v13 = vsub.s32 0, %v2087_v20  ;;  %v106_v14 = vld [vmem:[%s2694_s2] sm:$0x7]  ;;  %v114_v15 = vsub.s32 1, %v2087_v20  ;;  %v118_v16 = vsub.s32 2, %v2087_v20 }
  0x16   :  { %v111_v17 = vrot.slane %v106_v14, %v110_v13  ;;  %v115_v18 = vrot.slane %v106_v14, %v114_v15  ;;  %v119_v19 = vrot.slane %v106_v14, %v118_v16 }
  0x17   :  { %262 = vmatpush1.bf16.msra.mxu0 %v1858_v23  ;;  %1663 = vmatpush3.bf16.msra.mxu1 %v1859_v24 }
  0x18   :  { %263 = vmatprep.subr.bf16.mxu0 %v1860_v25  ;;  %1664 = vmatprep.subr.bf16.mxu1 %v2004_v1 }
  0x1b   :  { %264 = vmatpush1.bf16.msra.mxu0 %v1862_v41  ;;  %1665 = vmatpush3.bf16.msra.mxu1 %v1863_v42 }
  0x1c   :  { %265 = vmatprep.subr.bf16.mxu0 %v1864_v44  ;;  %1666 = vmatprep.subr.bf16.mxu1 %v2004_v1 }
  0x1f   :  { %266 = vmatpush1.bf16.msra.mxu0 %v1866_v48  ;;  %1667 = vmatpush3.bf16.msra.mxu1 %v1867_v49 }
  0x20   :  { %589 = vmatprep.subr.bf16.mxu0 %v2156_v50  ;;  %1672 = vmatprep.subr.bf16.mxu1 %v2004_v1 }
  0x22   :  { %284 = vmatmul.mubr.bf16.vlgmr.msra.gmra.mrb[0].mxu0 %v73_v51  ;;  %1669 = vmatmul.mubr.bf16.vlgmr.msra.gmra.mrb[0].mxu1 %v73_v51 }
  0x23   :  { %590 = vmatpush1.bf16.msra.mxu0 %v2162_v52  ;;  %1673 = vmatpush3.bf16.msra.mxu1 %v2173_v54 }
  0x24   :  { %591 = vmatprep.subr.bf16.mxu0 %v2167_v53  ;;  %1674 = vmatprep.subr.bf16.mxu1 %v2004_v1 }
  0x25   :  { %621 = vmatprep.mubr.bf16.mxu0 %v2005_v2  ;;  %1688 = vmatprep.mubr.msk.bf16.mxu1 %vm2006_vm0, %v2004_v1 }
  0x27   :  { %592 = vmatpush1.bf16.msra.mxu0 %v2179_v55  ;;  %1675 = vmatpush3.bf16.msra.mxu1 %v2192_v57 }
  0x28   :  { %593 = vmatprep.subr.bf16.mxu0 %v2185_v56  ;;  %1676 = vmatprep.subr.bf16.mxu1 %v2004_v1 }
  0x2b   :  { %594 = vmatpush1.bf16.msra.mxu0 %v2202_v58  ;;  %1677 = vmatpush3.bf16.msra.mxu1 %v2214_v60 }
  0x2c   :  { %595 = vmatprep.subr.bf16.mxu0 %v2208_v59  ;;  %1678 = vmatprep.subr.bf16.mxu1 %v2004_v1 }
  0x2f   :  { %596 = vmatpush1.bf16.msra.mxu0 %v2221_v61  ;;  %1679 = vmatpush3.bf16.msra.mxu1 %v2233_v63 }
  0x30   :  { %597 = vmatprep.subr.bf16.mxu0 %v2227_v62  ;;  %1680 = vmatprep.subr.bf16.mxu1 %v2004_v1 }
  0x33   :  { %598 = vmatpush1.bf16.msra.mxu0 %v2240_v0  ;;  %1681 = vmatpush3.bf16.msra.mxu1 %v2252_v4 }
  0x34   :  { %599 = vmatprep.subr.bf16.mxu0 %v2246_v3  ;;  %1682 = vmatprep.subr.bf16.mxu1 %v2004_v1 }
  0x37   :  { %600 = vmatpush1.bf16.msra.mxu0 %v2259_v5  ;;  %1683 = vmatpush3.bf16.msra.mxu1 %v2271_v7 }
  0x38   :  { %601 = vmatprep.subr.bf16.mxu0 %v2265_v6  ;;  %1684 = vmatprep.subr.bf16.mxu1 %v2004_v1 }
  0x3b   :  { %602 = vmatpush1.bf16.msra.mxu0 %v2278_v8  ;;  %1685 = vmatpush3.bf16.msra.mxu1 %v2290_v10 }
  0x3c   :  { %603 = vmatprep.subr.bf16.mxu0 %v2284_v9  ;;  %1686 = vmatprep.subr.bf16.mxu1 %v2004_v1 }
  0x3f   :  { %604 = vmatpush1.bf16.msra.mxu0 %v2297_v11  ;;  %1687 = vmatpush3.bf16.msra.mxu1 %v2304_v12 }
  0x40   :  { %707 = vmatprep.subr.bf16.mxu0 %v2156_v50  ;;  %1692 = vmatprep.subr.bf16.mxu1 %v2004_v1 }
  0x42   :  { %622 = vmatmul.mubr.bf16.vlgmr.msra.gmra.mrb[4].mxu0 %v2005_v2  ;;  %1689 = vmatmul.mubr.bf16.vlgmr.msra.gmra.mrb[4].mxu1 %v2005_v2 }
  0x43   :  { %708 = vmatpush1.bf16.msra.mxu0 %v2162_v52  ;;  %1693 = vmatpush3.bf16.msra.mxu1 %v2173_v54 }
  0x44   :  { %709 = vmatprep.subr.bf16.mxu0 %v2167_v53  ;;  %1694 = vmatprep.subr.bf16.mxu1 %v2004_v1 }
  0x45   :  { %739 = vmatprep.mubr.bf16.mxu0 %v2005_v2  ;;  %1708 = vmatprep.mubr.msk.bf16.mxu1 %vm2006_vm0, %v2004_v1 }
  0x47   :  { %710 = vmatpush1.bf16.msra.mxu0 %v2179_v55  ;;  %1695 = vmatpush3.bf16.msra.mxu1 %v2192_v57 }
  0x48   :  { %711 = vmatprep.subr.bf16.mxu0 %v2185_v56  ;;  %1696 = vmatprep.subr.bf16.mxu1 %v2004_v1 }
  0x4b   :  { %712 = vmatpush1.bf16.msra.mxu0 %v2202_v58  ;;  %1697 = vmatpush3.bf16.msra.mxu1 %v2214_v60 }
  0x4c   :  { %713 = vmatprep.subr.bf16.mxu0 %v2208_v59  ;;  %1698 = vmatprep.subr.bf16.mxu1 %v2004_v1 }
  0x4f   :  { %714 = vmatpush1.bf16.msra.mxu0 %v2221_v61  ;;  %1699 = vmatpush3.bf16.msra.mxu1 %v2233_v63 }
  0x50   :  { %715 = vmatprep.subr.bf16.mxu0 %v2227_v62  ;;  %1700 = vmatprep.subr.bf16.mxu1 %v2004_v1 }
  0x53   :  { %716 = vmatpush1.bf16.msra.mxu0 %v2240_v0  ;;  %1701 = vmatpush3.bf16.msra.mxu1 %v2252_v4 }
  0x54   :  { %717 = vmatprep.subr.bf16.mxu0 %v2246_v3  ;;  %1702 = vmatprep.subr.bf16.mxu1 %v2004_v1 }
  0x57   :  { %718 = vmatpush1.bf16.msra.mxu0 %v2259_v5  ;;  %1703 = vmatpush3.bf16.msra.mxu1 %v2271_v7 }
  0x58   :  { %719 = vmatprep.subr.bf16.mxu0 %v2265_v6  ;;  %1704 = vmatprep.subr.bf16.mxu1 %v2004_v1 }
  0x5b   :  { %720 = vmatpush1.bf16.msra.mxu0 %v2278_v8  ;;  %1705 = vmatpush3.bf16.msra.mxu1 %v2290_v10 }
  0x5c   :  { %721 = vmatprep.subr.bf16.mxu0 %v2284_v9  ;;  %1706 = vmatprep.subr.bf16.mxu1 %v2004_v1 }
  0x5f   :  { %722 = vmatpush1.bf16.msra.mxu0 %v2297_v11  ;;  %1707 = vmatpush3.bf16.msra.mxu1 %v2304_v12 }
  0x60   :  { %820 = vmatprep.subr.bf16.mxu0 %v2156_v50  ;;  %1712 = vmatprep.subr.bf16.mxu1 %v2004_v1 }
  0xf5   :  { %v285_v21 = vpop.f32.mrb[0].mxu0  ;;  %v328_v24 = vpop.f32.mrb[0].mxu1 }
  0xf6   :  { %v286_v22 = vadd.f32 %v285_v21, %v111_v17  ;;  %v287_v23 = vpop.f32.mrb[1].mxu0  ;;  %v329_v26 = vadd.f32 %v328_v24, %v119_v19  ;;  %v1670_v29 = vpop.f32.mrb[1].mxu1 }
  0xf7   :  { %v288_v25 = vadd.f32 %v287_v23, %v115_v18  ;;  %v289_v28 = vpop.f32.mrb[2].mxu0  ;;  %v331_v32 = vpop.f32.mrb[2].mxu1 }
  0xf8   :  { %v290_v30 = vadd.f32 %v289_v28, %v111_v17  ;;  %v291_v31 = vpop.f32.mrb[3].mxu0  ;;  %v343_v35 = vcombine.high %v329_v26, %v329_v26  ;;  %v364_v36 = vrot.slane %v329_v26, %v2109_v27  ;;  %v1671_v20 = vpop.f32.mrb[3].mxu1  ;;  %v332_v38 = vadd.f32 %v331_v32, %v119_v19 }
  0xf9   :  { %v341_v33 = vcombine.low %v286_v22, %v288_v25  ;;  %v342_v34 = vcombine.high %v286_v22, %v288_v25  ;;  %v292_v37 = vadd.f32 %v291_v31, %v115_v18  ;;  %v2365_v20 = vld [vmem:[%s2695_s4] ss:$0 sm:$0xff] }
  0xfa   :  { %v371_v41 = vrot.slane %v343_v35, %v2109_v27  ;;  %v378_v44 = vcombine.high %v332_v38, %v332_v38  ;;  %v399_v45 = vrot.slane %v332_v38, %v2109_v27 }
  0xfb   :  { %v350_v39 = vrot.slane %v341_v33, %v2109_v27  ;;  %v357_v40 = vrot.slane %v342_v34, %v2109_v27  ;;  %v376_v42 = vcombine.low %v290_v30, %v292_v37  ;;  %v377_v43 = vcombine.high %v290_v30, %v292_v37 }
  0xfc   :  { %v406_v14 = vrot.slane %v378_v44, %v2109_v27 }
  0xfd   :  { %v372_v46 = vcombine.low %v350_v39, %v364_v36  ;;  %v373_v47 = vcombine.high %v350_v39, %v364_v36  ;;  %v374_v48 = vcombine.low %v357_v40, %v371_v41  ;;  %v375_v49 = vcombine.high %v357_v40, %v371_v41 }
  0xfe   :  { %v385_v51 = vrot.slane %v376_v42, %v2109_v27  ;;  %v392_v13 = vrot.slane %v377_v43, %v2109_v27 }
  0xff   :  { %419 = vst [vmem:[#allocation2] sm:$0x3f] %v372_v46  ;;  %420 = vst [vmem:[#allocation2 + $0x6] sm:$0x3f] %v373_v47 }
 0x100   :  { %421 = vst [vmem:[#allocation2 + $0xc] sm:$0x3f] %v374_v48  ;;  %422 = vst [vmem:[#allocation2 + $0x12] sm:$0x3f] %v375_v49  ;;  %v407_v15 = vcombine.low %v385_v51, %v399_v45  ;;  %v408_v16 = vcombine.high %v385_v51, %v399_v45  ;;  %v409_v17 = vcombine.low %v392_v13, %v406_v14 }
 0x101   :  { %v410_v18 = vcombine.high %v392_v13, %v406_v14 }
 0x102   :  { %423 = vst [vmem:[#allocation2 + $0x18] sm:$0x3f] %v407_v15  ;;  %424 = vst [vmem:[#allocation2 + $0x1e] sm:$0x3f] %v408_v16 }
 0x103   :  { %425 = vst [vmem:[#allocation2 + $0x24] sm:$0x3f] %v409_v17  ;;  %426 = vst [vmem:[#allocation2 + $0x2a] sm:$0x3f] %v410_v18 }
 0x106   :  { %v460_v19 = vld [vmem:[#allocation2] sm:$0x3f]  ;;  %v705_v51 = vld [vmem:[#allocation2 + $0x6] sm:$0x3f] }
 0x107   :  { %v678_v25 = vrot.slane %v460_v19, 2  ;;  %v695_v40 = vrot.slane %v460_v19, 4  ;;  %v796_v18 = vrot.slane %v705_v51, 2 }
 0x115   :  { %v623_v21 = vpop.f32.mrb[4].mxu0  ;;  %v664_v24 = vpop.f32.mrb[4].mxu1 }
 0x116   :  { %v670_v22 = vadd.f32 %v623_v21, %v460_v19  ;;  %v625_v23 = vpop.f32.mrb[5].mxu0  ;;  %v1690_v27 = vpop.f32.mrb[5].mxu1  ;;  %v693_v38 = vadd.f32 %v2365_v20, %v664_v24 }
 0x117   :  { %v627_v26 = vpop.f32.mrb[6].mxu0  ;;  %v667_v30 = vpop.f32.mrb[6].mxu1  ;;  %v680_v31 = vadd.f32 %v678_v25, %v625_v23 }
 0x118   :  { %v1547_v28 = vmul.f32 -1.442695, %v670_v22  ;;  %v628_v29 = vpop.f32.mrb[7].mxu0  ;;  %v1691_v32 = vpop.f32.mrb[7].mxu1 }
 0x119   :  { %v1548_v33 = vmul.f32 -1.442695, %v680_v31 }
 0x11a   :  { %1900 = vpow2.f32 %v1547_v28 }
 0x11b   :  { %1902 = vpow2.f32 %v1548_v33  ;;  %v807_v33 = vrot.slane %v705_v51, 4 }
 0x124   :  { %v1901_v34 = vpop.eup %1900 }
 0x125   :  { %v674_v35 = vadd.f32 1.0, %v1901_v34  ;;  %v1903_v36 = vpop.eup %1902 }
 0x126   :  { %v684_v37 = vadd.f32 1.0, %v1903_v36 }
 0x127   :  { %1904 = vrcp.f32 %v674_v35 }
 0x128   :  { %1906 = vrcp.f32 %v684_v37 }
 0x131   :  { %v1905_v39 = vpop.eup %1904 }
 0x132   :  { %v694_v41 = vmul.f32 %v1905_v39, %v693_v38  ;;  %v1907_v43 = vpop.eup %1906 }
 0x133   :  { %v699_v44 = vsub.f32 1.0, %v1907_v43  ;;  %v701_v47 = vmul.f32 0.0, %v1907_v43  ;;  %v818_v43 = vld [vmem:[#allocation2 + $0xc] sm:$0x3f] }
 0x134   :  { %v697_v42 = vadd.f32 %v695_v40, %v694_v41 }
 0x136   :  { %1908 = vtanh.f32 %v697_v42 }
 0x140   :  { %v1909_v45 = vpop.eup %1908 }
 0x141   :  { %v700_v46 = vmul.f32 %v1909_v45, %v699_v44 }
 0x143   :  { %v2368_v48 = vadd.f32 %v701_v47, %v700_v46 }
 0x145   :  { %703 = vst [vmem:[%s2696_s5] sm:$0x3] %v2368_v48  ;;  %v706_v49 = vpack.c.bf16 %v2368_v48, %v2368_v48 }
 0x147   :  { %740 = vmatmul.mubr.bf16.vlgmr.msra.gmra.mrb[8].mxu0 %v706_v49  ;;  %1709 = vmatmul.mubr.bf16.vlgmr.msra.gmra.mrb[8].mxu1 %v706_v49  ;;  %v909_v49 = vrot.slane %v818_v43, 2 }
 0x148   :  { %821 = vmatpush1.bf16.msra.mxu0 %v2162_v52  ;;  %1713 = vmatpush3.bf16.msra.mxu1 %v2173_v54 }
 0x149   :  { %822 = vmatprep.subr.bf16.mxu0 %v2167_v53  ;;  %1714 = vmatprep.subr.bf16.mxu1 %v2004_v1 }
 0x14a   :  { %852 = vmatprep.mubr.bf16.mxu0 %v2005_v2  ;;  %1728 = vmatprep.mubr.msk.bf16.mxu1 %vm2006_vm0, %v2004_v1 }
 0x14c   :  { %823 = vmatpush1.bf16.msra.mxu0 %v2179_v55  ;;  %1715 = vmatpush3.bf16.msra.mxu1 %v2192_v57 }
 0x14d   :  { %824 = vmatprep.subr.bf16.mxu0 %v2185_v56  ;;  %1716 = vmatprep.subr.bf16.mxu1 %v2004_v1 }
 0x150   :  { %825 = vmatpush1.bf16.msra.mxu0 %v2202_v58  ;;  %1717 = vmatpush3.bf16.msra.mxu1 %v2214_v60 }
 0x151   :  { %826 = vmatprep.subr.bf16.mxu0 %v2208_v59  ;;  %1718 = vmatprep.subr.bf16.mxu1 %v2004_v1 }
 0x154   :  { %827 = vmatpush1.bf16.msra.mxu0 %v2221_v61  ;;  %1719 = vmatpush3.bf16.msra.mxu1 %v2233_v63 }
 0x155   :  { %828 = vmatprep.subr.bf16.mxu0 %v2227_v62  ;;  %1720 = vmatprep.subr.bf16.mxu1 %v2004_v1 }
 0x158   :  { %829 = vmatpush1.bf16.msra.mxu0 %v2240_v0  ;;  %1721 = vmatpush3.bf16.msra.mxu1 %v2252_v4 }
 0x159   :  { %830 = vmatprep.subr.bf16.mxu0 %v2246_v3  ;;  %1722 = vmatprep.subr.bf16.mxu1 %v2004_v1 }
 0x15c   :  { %831 = vmatpush1.bf16.msra.mxu0 %v2259_v5  ;;  %1723 = vmatpush3.bf16.msra.mxu1 %v2271_v7 }
 0x15d   :  { %832 = vmatprep.subr.bf16.mxu0 %v2265_v6  ;;  %1724 = vmatprep.subr.bf16.mxu1 %v2004_v1 }
 0x160   :  { %833 = vmatpush1.bf16.msra.mxu0 %v2278_v8  ;;  %1725 = vmatpush3.bf16.msra.mxu1 %v2290_v10 }
 0x161   :  { %834 = vmatprep.subr.bf16.mxu0 %v2284_v9  ;;  %1726 = vmatprep.subr.bf16.mxu1 %v2004_v1 }
 0x164   :  { %835 = vmatpush1.bf16.msra.mxu0 %v2297_v11  ;;  %1727 = vmatpush3.bf16.msra.mxu1 %v2304_v12 }
 0x165   :  { %933 = vmatprep.subr.bf16.mxu0 %v2156_v50  ;;  %1732 = vmatprep.subr.bf16.mxu1 %v2004_v1 }
 0x21a   :  { %v741_v13 = vpop.f32.mrb[8].mxu0  ;;  %v782_v14 = vpop.f32.mrb[8].mxu1 }
 0x21b   :  { %v788_v15 = vadd.f32 %v741_v13, %v705_v51  ;;  %v743_v16 = vpop.f32.mrb[9].mxu0  ;;  %v1710_v17 = vpop.f32.mrb[9].mxu1  ;;  %v805_v31 = vadd.f32 %v2365_v20, %v782_v14 }
 0x21c   :  { %v745_v19 = vpop.f32.mrb[10].mxu0  ;;  %v785_v21 = vpop.f32.mrb[10].mxu1  ;;  %v798_v25 = vadd.f32 %v796_v18, %v743_v16 }
 0x21d   :  { %v1550_v22 = vmul.f32 -1.442695, %v788_v15  ;;  %v746_v23 = vpop.f32.mrb[11].mxu0  ;;  %v1711_v24 = vpop.f32.mrb[11].mxu1 }
 0x21e   :  { %v1551_v26 = vmul.f32 -1.442695, %v798_v25 }
 0x21f   :  { %1910 = vpow2.f32 %v1550_v22 }
 0x220   :  { %1912 = vpow2.f32 %v1551_v26  ;;  %v920_v26 = vrot.slane %v818_v43, 4 }
 0x229   :  { %v1911_v27 = vpop.eup %1910 }
 0x22a   :  { %v792_v28 = vadd.f32 1.0, %v1911_v27  ;;  %v1913_v29 = vpop.eup %1912 }
 0x22b   :  { %v802_v30 = vadd.f32 1.0, %v1913_v29 }
 0x22c   :  { %1914 = vrcp.f32 %v792_v28 }
 0x22d   :  { %1916 = vrcp.f32 %v802_v30 }
 0x236   :  { %v1915_v32 = vpop.eup %1914 }
 0x237   :  { %v806_v34 = vmul.f32 %v1915_v32, %v805_v31  ;;  %v1917_v36 = vpop.eup %1916 }
 0x238   :  { %v811_v37 = vsub.f32 1.0, %v1917_v36  ;;  %v813_v40 = vmul.f32 %v1917_v36, %v2368_v48  ;;  %v931_v36 = vld [vmem:[#allocation2 + $0x12] sm:$0x3f] }
 0x239   :  { %v809_v35 = vadd.f32 %v807_v33, %v806_v34 }
 0x23b   :  { %1918 = vtanh.f32 %v809_v35 }
 0x245   :  { %v1919_v38 = vpop.eup %1918 }
 0x246   :  { %v812_v39 = vmul.f32 %v1919_v38, %v811_v37 }
 0x248   :  { %v2413_v41 = vadd.f32 %v813_v40, %v812_v39 }
 0x24a   :  { %1552 = vst [vmem:[%s2696_s5 + $0x2] sm:$0x3] %v2413_v41  ;;  %v819_v42 = vpack.c.bf16 %v2413_v41, %v2413_v41 }
 0x24c   :  { %853 = vmatmul.mubr.bf16.vlgmr.msra.gmra.mrb[12].mxu0 %v819_v42  ;;  %1729 = vmatmul.mubr.bf16.vlgmr.msra.gmra.mrb[12].mxu1 %v819_v42  ;;  %v1022_v42 = vrot.slane %v931_v36, 2 }
 0x24d   :  { %934 = vmatpush1.bf16.msra.mxu0 %v2162_v52  ;;  %1733 = vmatpush3.bf16.msra.mxu1 %v2173_v54 }
 0x24e   :  { %935 = vmatprep.subr.bf16.mxu0 %v2167_v53  ;;  %1734 = vmatprep.subr.bf16.mxu1 %v2004_v1 }
 0x24f   :  { %965 = vmatprep.mubr.bf16.mxu0 %v2005_v2  ;;  %1748 = vmatprep.mubr.msk.bf16.mxu1 %vm2006_vm0, %v2004_v1 }
 0x251   :  { %936 = vmatpush1.bf16.msra.mxu0 %v2179_v55  ;;  %1735 = vmatpush3.bf16.msra.mxu1 %v2192_v57 }
 0x252   :  { %937 = vmatprep.subr.bf16.mxu0 %v2185_v56  ;;  %1736 = vmatprep.subr.bf16.mxu1 %v2004_v1 }
 0x255   :  { %938 = vmatpush1.bf16.msra.mxu0 %v2202_v58  ;;  %1737 = vmatpush3.bf16.msra.mxu1 %v2214_v60 }
 0x256   :  { %939 = vmatprep.subr.bf16.mxu0 %v2208_v59  ;;  %1738 = vmatprep.subr.bf16.mxu1 %v2004_v1 }
 0x259   :  { %940 = vmatpush1.bf16.msra.mxu0 %v2221_v61  ;;  %1739 = vmatpush3.bf16.msra.mxu1 %v2233_v63 }
 0x25a   :  { %941 = vmatprep.subr.bf16.mxu0 %v2227_v62  ;;  %1740 = vmatprep.subr.bf16.mxu1 %v2004_v1 }
 0x25d   :  { %942 = vmatpush1.bf16.msra.mxu0 %v2240_v0  ;;  %1741 = vmatpush3.bf16.msra.mxu1 %v2252_v4 }
 0x25e   :  { %943 = vmatprep.subr.bf16.mxu0 %v2246_v3  ;;  %1742 = vmatprep.subr.bf16.mxu1 %v2004_v1 }
 0x261   :  { %944 = vmatpush1.bf16.msra.mxu0 %v2259_v5  ;;  %1743 = vmatpush3.bf16.msra.mxu1 %v2271_v7 }
 0x262   :  { %945 = vmatprep.subr.bf16.mxu0 %v2265_v6  ;;  %1744 = vmatprep.subr.bf16.mxu1 %v2004_v1 }
 0x265   :  { %946 = vmatpush1.bf16.msra.mxu0 %v2278_v8  ;;  %1745 = vmatpush3.bf16.msra.mxu1 %v2290_v10 }
 0x266   :  { %947 = vmatprep.subr.bf16.mxu0 %v2284_v9  ;;  %1746 = vmatprep.subr.bf16.mxu1 %v2004_v1 }
 0x269   :  { %948 = vmatpush1.bf16.msra.mxu0 %v2297_v11  ;;  %1747 = vmatpush3.bf16.msra.mxu1 %v2304_v12 }
 0x26a   :  { %1046 = vmatprep.subr.bf16.mxu0 %v2156_v50  ;;  %1752 = vmatprep.subr.bf16.mxu1 %v2004_v1 }
 0x31f   :  { %v854_v44 = vpop.f32.mrb[12].mxu0  ;;  %v895_v45 = vpop.f32.mrb[12].mxu1 }
 0x320   :  { %v901_v46 = vadd.f32 %v854_v44, %v818_v43  ;;  %v856_v47 = vpop.f32.mrb[13].mxu0  ;;  %v1730_v48 = vpop.f32.mrb[13].mxu1  ;;  %v918_v24 = vadd.f32 %v2365_v20, %v895_v45 }
 0x321   :  { %v858_v51 = vpop.f32.mrb[14].mxu0  ;;  %v898_v13 = vpop.f32.mrb[14].mxu1  ;;  %v911_v17 = vadd.f32 %v909_v49, %v856_v47 }
 0x322   :  { %v1553_v14 = vmul.f32 -1.442695, %v901_v46  ;;  %v859_v15 = vpop.f32.mrb[15].mxu0  ;;  %v1731_v16 = vpop.f32.mrb[15].mxu1 }
 0x323   :  { %v1554_v18 = vmul.f32 -1.442695, %v911_v17 }
 0x324   :  { %1920 = vpow2.f32 %v1553_v14 }
 0x325   :  { %1922 = vpow2.f32 %v1554_v18  ;;  %v1033_v18 = vrot.slane %v931_v36, 4 }
 0x32e   :  { %v1921_v19 = vpop.eup %1920 }
 0x32f   :  { %v905_v21 = vadd.f32 1.0, %v1921_v19  ;;  %v1923_v22 = vpop.eup %1922 }
 0x330   :  { %v915_v23 = vadd.f32 1.0, %v1923_v22 }
 0x331   :  { %1924 = vrcp.f32 %v905_v21 }
 0x332   :  { %1926 = vrcp.f32 %v915_v23 }
 0x33b   :  { %v1925_v25 = vpop.eup %1924 }
 0x33c   :  { %v919_v27 = vmul.f32 %v1925_v25, %v918_v24  ;;  %v1927_v29 = vpop.eup %1926 }
 0x33d   :  { %v924_v30 = vsub.f32 1.0, %v1927_v29  ;;  %v926_v33 = vmul.f32 %v1927_v29, %v2413_v41  ;;  %v1044_v29 = vld [vmem:[#allocation2 + $0x18] sm:$0x3f] }
 0x33e   :  { %v922_v28 = vadd.f32 %v920_v26, %v919_v27 }
 0x340   :  { %1928 = vtanh.f32 %v922_v28 }
 0x34a   :  { %v1929_v31 = vpop.eup %1928 }
 0x34b   :  { %v925_v32 = vmul.f32 %v1929_v31, %v924_v30 }
 0x34d   :  { %v2458_v34 = vadd.f32 %v926_v33, %v925_v32 }
 0x34f   :  { %1555 = vst [vmem:[%s2696_s5 + $0x4] sm:$0x3] %v2458_v34  ;;  %v932_v35 = vpack.c.bf16 %v2458_v34, %v2458_v34 }
 0x351   :  { %966 = vmatmul.mubr.bf16.vlgmr.msra.gmra.mrb[16].mxu0 %v932_v35  ;;  %1749 = vmatmul.mubr.bf16.vlgmr.msra.gmra.mrb[16].mxu1 %v932_v35  ;;  %v1135_v35 = vrot.slane %v1044_v29, 2 }
 0x352   :  { %1047 = vmatpush1.bf16.msra.mxu0 %v2162_v52  ;;  %1753 = vmatpush3.bf16.msra.mxu1 %v2173_v54 }
 0x353   :  { %1048 = vmatprep.subr.bf16.mxu0 %v2167_v53  ;;  %1754 = vmatprep.subr.bf16.mxu1 %v2004_v1 }
 0x354   :  { %1078 = vmatprep.mubr.bf16.mxu0 %v2005_v2  ;;  %1768 = vmatprep.mubr.msk.bf16.mxu1 %vm2006_vm0, %v2004_v1 }
 0x356   :  { %1049 = vmatpush1.bf16.msra.mxu0 %v2179_v55  ;;  %1755 = vmatpush3.bf16.msra.mxu1 %v2192_v57 }
 0x357   :  { %1050 = vmatprep.subr.bf16.mxu0 %v2185_v56  ;;  %1756 = vmatprep.subr.bf16.mxu1 %v2004_v1 }
 0x35a   :  { %1051 = vmatpush1.bf16.msra.mxu0 %v2202_v58  ;;  %1757 = vmatpush3.bf16.msra.mxu1 %v2214_v60 }
 0x35b   :  { %1052 = vmatprep.subr.bf16.mxu0 %v2208_v59  ;;  %1758 = vmatprep.subr.bf16.mxu1 %v2004_v1 }
 0x35e   :  { %1053 = vmatpush1.bf16.msra.mxu0 %v2221_v61  ;;  %1759 = vmatpush3.bf16.msra.mxu1 %v2233_v63 }
 0x35f   :  { %1054 = vmatprep.subr.bf16.mxu0 %v2227_v62  ;;  %1760 = vmatprep.subr.bf16.mxu1 %v2004_v1 }
 0x362   :  { %1055 = vmatpush1.bf16.msra.mxu0 %v2240_v0  ;;  %1761 = vmatpush3.bf16.msra.mxu1 %v2252_v4 }
 0x363   :  { %1056 = vmatprep.subr.bf16.mxu0 %v2246_v3  ;;  %1762 = vmatprep.subr.bf16.mxu1 %v2004_v1 }
 0x366   :  { %1057 = vmatpush1.bf16.msra.mxu0 %v2259_v5  ;;  %1763 = vmatpush3.bf16.msra.mxu1 %v2271_v7 }
 0x367   :  { %1058 = vmatprep.subr.bf16.mxu0 %v2265_v6  ;;  %1764 = vmatprep.subr.bf16.mxu1 %v2004_v1 }
 0x36a   :  { %1059 = vmatpush1.bf16.msra.mxu0 %v2278_v8  ;;  %1765 = vmatpush3.bf16.msra.mxu1 %v2290_v10 }
 0x36b   :  { %1060 = vmatprep.subr.bf16.mxu0 %v2284_v9  ;;  %1766 = vmatprep.subr.bf16.mxu1 %v2004_v1 }
 0x36e   :  { %1061 = vmatpush1.bf16.msra.mxu0 %v2297_v11  ;;  %1767 = vmatpush3.bf16.msra.mxu1 %v2304_v12 }
 0x36f   :  { %1159 = vmatprep.subr.bf16.mxu0 %v2156_v50  ;;  %1772 = vmatprep.subr.bf16.mxu1 %v2004_v1 }
 0x424   :  { %v967_v37 = vpop.f32.mrb[16].mxu0  ;;  %v1008_v38 = vpop.f32.mrb[16].mxu1 }
 0x425   :  { %v1014_v39 = vadd.f32 %v967_v37, %v931_v36  ;;  %v969_v40 = vpop.f32.mrb[17].mxu0  ;;  %v1750_v41 = vpop.f32.mrb[17].mxu1  ;;  %v1031_v16 = vadd.f32 %v2365_v20, %v1008_v38 }
 0x426   :  { %v971_v43 = vpop.f32.mrb[18].mxu0  ;;  %v1011_v44 = vpop.f32.mrb[18].mxu1  ;;  %v1024_v48 = vadd.f32 %v1022_v42, %v969_v40 }
 0x427   :  { %v1556_v45 = vmul.f32 -1.442695, %v1014_v39  ;;  %v972_v46 = vpop.f32.mrb[19].mxu0  ;;  %v1751_v47 = vpop.f32.mrb[19].mxu1 }
 0x428   :  { %v1557_v49 = vmul.f32 -1.442695, %v1024_v48  ;;  %v1146_v48 = vrot.slane %v1044_v29, 4 }
 0x429   :  { %1930 = vpow2.f32 %v1556_v45 }
 0x42a   :  { %1932 = vpow2.f32 %v1557_v49 }
 0x433   :  { %v1931_v51 = vpop.eup %1930 }
 0x434   :  { %v1018_v13 = vadd.f32 1.0, %v1931_v51  ;;  %v1933_v14 = vpop.eup %1932 }
 0x435   :  { %v1028_v15 = vadd.f32 1.0, %v1933_v14 }
 0x436   :  { %1934 = vrcp.f32 %v1018_v13 }
 0x437   :  { %1936 = vrcp.f32 %v1028_v15 }
 0x440   :  { %v1935_v17 = vpop.eup %1934 }
 0x441   :  { %v1032_v19 = vmul.f32 %v1935_v17, %v1031_v16  ;;  %v1937_v22 = vpop.eup %1936 }
 0x442   :  { %v1037_v23 = vsub.f32 1.0, %v1937_v22  ;;  %v1039_v26 = vmul.f32 %v1937_v22, %v2458_v34 }
 0x443   :  { %v1035_v21 = vadd.f32 %v1033_v18, %v1032_v19 }
 0x445   :  { %1938 = vtanh.f32 %v1035_v21 }
 0x44f   :  { %v1939_v24 = vpop.eup %1938 }
 0x450   :  { %v1038_v25 = vmul.f32 %v1939_v24, %v1037_v23 }
 0x452   :  { %v2503_v27 = vadd.f32 %v1039_v26, %v1038_v25 }
 0x454   :  { %1558 = vst [vmem:[%s2696_s5 + $0x6] sm:$0x3] %v2503_v27  ;;  %v1045_v28 = vpack.c.bf16 %v2503_v27, %v2503_v27 }
 0x456   :  { %1079 = vmatmul.mubr.bf16.vlgmr.msra.gmra.mrb[20].mxu0 %v1045_v28  ;;  %1769 = vmatmul.mubr.bf16.vlgmr.msra.gmra.mrb[20].mxu1 %v1045_v28 }
 0x457   :  { %1160 = vmatpush1.bf16.msra.mxu0 %v2162_v52  ;;  %1773 = vmatpush3.bf16.msra.mxu1 %v2173_v54 }
 0x458   :  { %1161 = vmatprep.subr.bf16.mxu0 %v2167_v53  ;;  %1774 = vmatprep.subr.bf16.mxu1 %v2004_v1 }
 0x459   :  { %1191 = vmatprep.mubr.bf16.mxu0 %v2005_v2  ;;  %1788 = vmatprep.mubr.msk.bf16.mxu1 %vm2006_vm0, %v2004_v1 }
 0x45b   :  { %1162 = vmatpush1.bf16.msra.mxu0 %v2179_v55  ;;  %1775 = vmatpush3.bf16.msra.mxu1 %v2192_v57 }
 0x45c   :  { %1163 = vmatprep.subr.bf16.mxu0 %v2185_v56  ;;  %1776 = vmatprep.subr.bf16.mxu1 %v2004_v1 }
 0x45f   :  { %1164 = vmatpush1.bf16.msra.mxu0 %v2202_v58  ;;  %1777 = vmatpush3.bf16.msra.mxu1 %v2214_v60 }
 0x460   :  { %1165 = vmatprep.subr.bf16.mxu0 %v2208_v59  ;;  %1778 = vmatprep.subr.bf16.mxu1 %v2004_v1 }
 0x463   :  { %1166 = vmatpush1.bf16.msra.mxu0 %v2221_v61  ;;  %1779 = vmatpush3.bf16.msra.mxu1 %v2233_v63 }
 0x464   :  { %1167 = vmatprep.subr.bf16.mxu0 %v2227_v62  ;;  %1780 = vmatprep.subr.bf16.mxu1 %v2004_v1 }
 0x467   :  { %1168 = vmatpush1.bf16.msra.mxu0 %v2240_v0  ;;  %1781 = vmatpush3.bf16.msra.mxu1 %v2252_v4 }
 0x468   :  { %1169 = vmatprep.subr.bf16.mxu0 %v2246_v3  ;;  %1782 = vmatprep.subr.bf16.mxu1 %v2004_v1 }
 0x46b   :  { %1170 = vmatpush1.bf16.msra.mxu0 %v2259_v5  ;;  %1783 = vmatpush3.bf16.msra.mxu1 %v2271_v7 }
 0x46c   :  { %1171 = vmatprep.subr.bf16.mxu0 %v2265_v6  ;;  %1784 = vmatprep.subr.bf16.mxu1 %v2004_v1 }
 0x46f   :  { %1172 = vmatpush1.bf16.msra.mxu0 %v2278_v8  ;;  %1785 = vmatpush3.bf16.msra.mxu1 %v2290_v10 }
 0x470   :  { %1173 = vmatprep.subr.bf16.mxu0 %v2284_v9  ;;  %1786 = vmatprep.subr.bf16.mxu1 %v2004_v1 }
 0x473   :  { %1174 = vmatpush1.bf16.msra.mxu0 %v2297_v11  ;;  %1787 = vmatpush3.bf16.msra.mxu1 %v2304_v12 }
 0x474   :  { %1272 = vmatprep.subr.bf16.mxu0 %v2156_v50  ;;  %1792 = vmatprep.subr.bf16.mxu1 %v2004_v1 }
 0x529   :  { %v1080_v30 = vpop.f32.mrb[20].mxu0  ;;  %v1121_v31 = vpop.f32.mrb[20].mxu1 }
 0x52a   :  { %v1127_v32 = vadd.f32 %v1080_v30, %v1044_v29  ;;  %v1082_v33 = vpop.f32.mrb[21].mxu0  ;;  %v1770_v34 = vpop.f32.mrb[21].mxu1  ;;  %v1144_v46 = vadd.f32 %v2365_v20, %v1121_v31  ;;  %v1981_v29 = vld [vmem:[%s2693_s3] ss:$12 sps:$4 sm:$0xff]   ;;  %v1982_v30 = vld [vmem:[%s2693_s3 + $0x8] ss:$12 sps:$4 sm:$0xff]  }
 0x52b   :  { %v1084_v36 = vpop.f32.mrb[22].mxu0  ;;  %v1124_v37 = vpop.f32.mrb[22].mxu1  ;;  %v1137_v41 = vadd.f32 %v1135_v35, %v1082_v33  ;;  %v1983_v31 = vld [vmem:[%s2693_s3 + $0x1c] ss:$12 sps:$4 sm:$0xff]   ;;  %v1985_v33 = vld [vmem:[%s2693_s3 + $0x20] ss:$12 sps:$4 sm:$0xff]  }
 0x52c   :  { %v1559_v38 = vmul.f32 -1.442695, %v1127_v32  ;;  %v1085_v39 = vpop.f32.mrb[23].mxu0  ;;  %v1771_v40 = vpop.f32.mrb[23].mxu1  ;;  %v1984_v32 = vld [vmem:[%s2693_s3 + $0x18] ss:$12 sps:$4 sm:$0xff]  }
 0x52d   :  { %v1560_v42 = vmul.f32 -1.442695, %v1137_v41  ;;  %v1986_v34 = vld [vmem:[%s2693_s3 + $0x34] ss:$12 sps:$4 sm:$0xff]   ;;  %v1988_v35 = vld [vmem:[%s2693_s3 + $0x38] ss:$12 sps:$4 sm:$0xff]  }
 0x52e   :  { %1940 = vpow2.f32 %v1559_v38  ;;  %v1989_v36 = vld [vmem:[%s2693_s3 + $0x4c] ss:$12 sps:$4 sm:$0xff]   ;;  %v1990_v37 = vld [vmem:[%s2693_s3 + $0x48] ss:$12 sps:$4 sm:$0xff]   ;;  %v1991_v38 = vld [vmem:[%s2693_s3 + $0x50] ss:$12 sps:$4 sm:$0xff]  }
 0x52f   :  { %1942 = vpow2.f32 %v1560_v42  ;;  %v1992_v39 = vld [vmem:[%s2693_s3 + $0x64] ss:$12 sps:$4 sm:$0xff]   ;;  %v1993_v40 = vld [vmem:[%s2693_s3 + $0x60] ss:$12 sps:$4 sm:$0xff]   ;;  %v1994_v41 = vld [vmem:[%s2693_s3 + $0x68] ss:$12 sps:$4 sm:$0xff]  }
 0x530   :  { %v1995_v42 = vld [vmem:[%s2693_s3 + $0x7c] ss:$12 sps:$4 sm:$0xff]  }
 0x538   :  { %v1941_v43 = vpop.eup %1940 }
 0x539   :  { %v1131_v50 = vadd.f32 1.0, %v1941_v43  ;;  %v1943_v44 = vpop.eup %1942  ;;  %v1996_v43 = vld [vmem:[%s2693_s3 + $0x78] ss:$12 sps:$4 sm:$0xff]  }
 0x53a   :  { %v1141_v45 = vadd.f32 1.0, %v1943_v44  ;;  %v1998_v44 = vld [vmem:[%s2693_s3 + $0x94] ss:$12 sps:$4 sm:$0xff]  }
 0x53b   :  { %1944 = vrcp.f32 %v1131_v50  ;;  %v1997_v50 = vld [vmem:[%s2693_s3 + $0x80] ss:$12 sps:$4 sm:$0xff]  }
 0x53c   :  { %1946 = vrcp.f32 %v1141_v45  ;;  %v1999_v45 = vld [vmem:[%s2693_s3 + $0x90] ss:$12 sps:$4 sm:$0xff]  }
 0x545   :  { %v1945_v47 = vpop.eup %1944 }
 0x546   :  { %v1145_v49 = vmul.f32 %v1945_v47, %v1144_v46  ;;  %v1947_v13 = vpop.eup %1946  ;;  %v2000_v46 = vld [vmem:[%s2693_s3 + $0x98] ss:$12 sps:$4 sm:$0xff]  }
 0x547   :  { %v1150_v14 = vsub.f32 1.0, %v1947_v13  ;;  %v1152_v17 = vmul.f32 %v1947_v13, %v2503_v27  ;;  %v2001_v47 = vld [vmem:[%s2693_s3 + $0xac] ss:$12 sps:$4 sm:$0xff]  }
 0x548   :  { %v1148_v51 = vadd.f32 %v1146_v48, %v1145_v49  ;;  %v2002_v48 = vld [vmem:[%s2693_s3 + $0xa8] ss:$12 sps:$4 sm:$0xff]   ;;  %v2003_v49 = vld [vmem:[%s2693_s3 + $0xb0] ss:$12 sps:$4 sm:$0xff]  }
 0x54a   :  { %1948 = vtanh.f32 %v1148_v51  ;;  %v1270_v51 = vld [vmem:[#allocation2 + $0x24] sm:$0x3f] }
 0x554   :  { %v1949_v15 = vpop.eup %1948 }
 0x555   :  { %v1151_v16 = vmul.f32 %v1949_v15, %v1150_v14 }
 0x557   :  { %v2548_v18 = vadd.f32 %v1152_v17, %v1151_v16 }
 0x559   :  { %1561 = vst [vmem:[%s2696_s5 + $0x8] sm:$0x3] %v2548_v18  ;;  %v1158_v19 = vpack.c.bf16 %v2548_v18, %v2548_v18 }
 0x55b   :  { %1192 = vmatmul.mubr.bf16.vlgmr.msra.gmra.mrb[24].mxu0 %v1158_v19  ;;  %1789 = vmatmul.mubr.bf16.vlgmr.msra.gmra.mrb[24].mxu1 %v1158_v19 }
 0x55c   :  { %1273 = vmatpush1.bf16.msra.mxu0 %v2162_v52  ;;  %1793 = vmatpush3.bf16.msra.mxu1 %v2173_v54  ;;  %v1980_v52 = vld [vmem:[%s2693_s3 + $0x4] ss:$12 sps:$4 sm:$0xff]  }
 0x55d   :  { %1274 = vmatprep.subr.bf16.mxu0 %v2167_v53  ;;  %1794 = vmatprep.subr.bf16.mxu1 %v2004_v1  ;;  %v1157_v53 = vld [vmem:[#allocation2 + $0x1e] sm:$0x3f] }
 0x55e   :  { %1304 = vmatprep.mubr.bf16.mxu0 %v2005_v2  ;;  %1808 = vmatprep.mubr.msk.bf16.mxu1 %vm2006_vm0, %v2004_v1 }
 0x560   :  { %1275 = vmatpush1.bf16.msra.mxu0 %v2179_v55  ;;  %1795 = vmatpush3.bf16.msra.mxu1 %v2192_v57 }
 0x561   :  { %1276 = vmatprep.subr.bf16.mxu0 %v2185_v56  ;;  %1796 = vmatprep.subr.bf16.mxu1 %v2004_v1 }
 0x564   :  { %1277 = vmatpush1.bf16.msra.mxu0 %v2202_v58  ;;  %1797 = vmatpush3.bf16.msra.mxu1 %v2214_v60 }
 0x565   :  { %1278 = vmatprep.subr.bf16.mxu0 %v2208_v59  ;;  %1798 = vmatprep.subr.bf16.mxu1 %v2004_v1  ;;  %v1248_v59 = vrot.slane %v1157_v53, 2 }
 0x568   :  { %1279 = vmatpush1.bf16.msra.mxu0 %v2221_v61  ;;  %1799 = vmatpush3.bf16.msra.mxu1 %v2233_v63 }
 0x569   :  { %1280 = vmatprep.subr.bf16.mxu0 %v2227_v62  ;;  %1800 = vmatprep.subr.bf16.mxu1 %v2004_v1 }
 0x56c   :  { %1281 = vmatpush1.bf16.msra.mxu0 %v2240_v0  ;;  %1801 = vmatpush3.bf16.msra.mxu1 %v2252_v4 }
 0x56d   :  { %1282 = vmatprep.subr.bf16.mxu0 %v2246_v3  ;;  %1802 = vmatprep.subr.bf16.mxu1 %v2004_v1 }
 0x570   :  { %1283 = vmatpush1.bf16.msra.mxu0 %v2259_v5  ;;  %1803 = vmatpush3.bf16.msra.mxu1 %v2271_v7 }
 0x571   :  { %1284 = vmatprep.subr.bf16.mxu0 %v2265_v6  ;;  %1804 = vmatprep.subr.bf16.mxu1 %v2004_v1 }
 0x574   :  { %1285 = vmatpush1.bf16.msra.mxu0 %v2278_v8  ;;  %1805 = vmatpush3.bf16.msra.mxu1 %v2290_v10 }
 0x575   :  { %1286 = vmatprep.subr.bf16.mxu0 %v2284_v9  ;;  %1806 = vmatprep.subr.bf16.mxu1 %v2004_v1 }
 0x578   :  { %1287 = vmatpush1.bf16.msra.mxu0 %v2297_v11  ;;  %1807 = vmatpush3.bf16.msra.mxu1 %v2304_v12  ;;  %v1259_v11 = vrot.slane %v1157_v53, 4 }
 0x579   :  { %1385 = vmatprep.subr.bf16.mxu0 %v1980_v52  ;;  %1812 = vmatprep.subr.bf16.mxu1 %v2004_v1 }
 0x62e   :  { %v1193_v54 = vpop.f32.mrb[24].mxu0  ;;  %v1234_v55 = vpop.f32.mrb[24].mxu1 }
 0x62f   :  { %v1240_v56 = vadd.f32 %v1193_v54, %v1157_v53  ;;  %v1195_v57 = vpop.f32.mrb[25].mxu0  ;;  %v1790_v58 = vpop.f32.mrb[25].mxu1  ;;  %v1257_v9 = vadd.f32 %v2365_v20, %v1234_v55 }
 0x630   :  { %v1197_v60 = vpop.f32.mrb[26].mxu0  ;;  %v1237_v61 = vpop.f32.mrb[26].mxu1  ;;  %v1250_v3 = vadd.f32 %v1248_v59, %v1195_v57 }
 0x631   :  { %v1562_v62 = vmul.f32 -1.442695, %v1240_v56  ;;  %v1198_v63 = vpop.f32.mrb[27].mxu0  ;;  %v1791_v0 = vpop.f32.mrb[27].mxu1 }
 0x632   :  { %v1563_v4 = vmul.f32 -1.442695, %v1250_v3  ;;  %v1372_v63 = vrot.slane %v1270_v51, 4 }
 0x633   :  { %1950 = vpow2.f32 %v1562_v62 }
 0x634   :  { %1952 = vpow2.f32 %v1563_v4 }
 0x63d   :  { %v1951_v5 = vpop.eup %1950 }
 0x63e   :  { %v1244_v6 = vadd.f32 1.0, %v1951_v5  ;;  %v1953_v7 = vpop.eup %1952 }
 0x63f   :  { %v1254_v8 = vadd.f32 1.0, %v1953_v7 }
 0x640   :  { %1954 = vrcp.f32 %v1244_v6 }
 0x641   :  { %1956 = vrcp.f32 %v1254_v8 }
 0x64a   :  { %v1955_v10 = vpop.eup %1954 }
 0x64b   :  { %v1258_v12 = vmul.f32 %v1955_v10, %v1257_v9  ;;  %v1957_v22 = vpop.eup %1956 }
 0x64c   :  { %v1263_v23 = vsub.f32 1.0, %v1957_v22  ;;  %v1265_v26 = vmul.f32 %v1957_v22, %v2548_v18  ;;  %v1361_v18 = vrot.slane %v1270_v51, 2 }
 0x64d   :  { %v1261_v21 = vadd.f32 %v1259_v11, %v1258_v12  ;;  %v1383_v11 = vld [vmem:[#allocation2 + $0x2a] sm:$0x3f] }
 0x64f   :  { %1958 = vtanh.f32 %v1261_v21 }
 0x659   :  { %v1959_v24 = vpop.eup %1958 }
 0x65a   :  { %v1264_v25 = vmul.f32 %v1959_v24, %v1263_v23 }
 0x65c   :  { %v2595_v27 = vadd.f32 %v1265_v26, %v1264_v25  ;;  %v1474_v25 = vrot.slane %v1383_v11, 2 }
 0x65e   :  { %1564 = vst [vmem:[%s2696_s5 + $0xa] sm:$0x3] %v2595_v27  ;;  %v1271_v28 = vpack.c.bf16 %v2595_v27, %v2595_v27 }
 0x660   :  { %1305 = vmatmul.mubr.bf16.vlgmr.msra.gmra.mrb[28].mxu0 %v1271_v28  ;;  %1809 = vmatmul.mubr.bf16.vlgmr.msra.gmra.mrb[28].mxu1 %v1271_v28 }
 0x661   :  { %1386 = vmatpush1.bf16.msra.mxu0 %v1981_v29  ;;  %1813 = vmatpush3.bf16.msra.mxu1 %v1982_v30 }
 0x662   :  { %1387 = vmatprep.subr.bf16.mxu0 %v1983_v31  ;;  %1814 = vmatprep.subr.bf16.mxu1 %v2004_v1 }
 0x663   :  { %1417 = vmatprep.mubr.bf16.mxu0 %v2005_v2  ;;  %1828 = vmatprep.mubr.msk.bf16.mxu1 %vm2006_vm0, %v2004_v1  ;;  %v1987_v2 = vld [vmem:[%s2693_s3 + $0x30] ss:$12 sps:$4 sm:$0xff]  }
 0x665   :  { %1388 = vmatpush1.bf16.msra.mxu0 %v1984_v32  ;;  %1815 = vmatpush3.bf16.msra.mxu1 %v1985_v33 }
 0x666   :  { %1389 = vmatprep.subr.bf16.mxu0 %v1986_v34  ;;  %1816 = vmatprep.subr.bf16.mxu1 %v2004_v1 }
 0x669   :  { %1390 = vmatpush1.bf16.msra.mxu0 %v1987_v2  ;;  %1817 = vmatpush3.bf16.msra.mxu1 %v1988_v35 }
 0x66a   :  { %1391 = vmatprep.subr.bf16.mxu0 %v1989_v36  ;;  %1818 = vmatprep.subr.bf16.mxu1 %v2004_v1 }
 0x66d   :  { %1392 = vmatpush1.bf16.msra.mxu0 %v1990_v37  ;;  %1819 = vmatpush3.bf16.msra.mxu1 %v1991_v38  ;;  %v1485_v38 = vrot.slane %v1383_v11, 4 }
 0x66e   :  { %1393 = vmatprep.subr.bf16.mxu0 %v1992_v39  ;;  %1820 = vmatprep.subr.bf16.mxu1 %v2004_v1 }
 0x671   :  { %1394 = vmatpush1.bf16.msra.mxu0 %v1993_v40  ;;  %1821 = vmatpush3.bf16.msra.mxu1 %v1994_v41 }
 0x672   :  { %1395 = vmatprep.subr.bf16.mxu0 %v1995_v42  ;;  %1822 = vmatprep.subr.bf16.mxu1 %v2004_v1 }
 0x675   :  { %1396 = vmatpush1.bf16.msra.mxu0 %v1996_v43  ;;  %1823 = vmatpush3.bf16.msra.mxu1 %v1997_v50 }
 0x676   :  { %1397 = vmatprep.subr.bf16.mxu0 %v1998_v44  ;;  %1824 = vmatprep.subr.bf16.mxu1 %v2004_v1 }
 0x679   :  { %1398 = vmatpush1.bf16.msra.mxu0 %v1999_v45  ;;  %1825 = vmatpush3.bf16.msra.mxu1 %v2000_v46 }
 0x67a   :  { %1399 = vmatprep.subr.bf16.mxu0 %v2001_v47  ;;  %1826 = vmatprep.subr.bf16.mxu1 %v2004_v1 }
 0x67d   :  { %1400 = vmatpush1.bf16.msra.mxu0 %v2002_v48  ;;  %1827 = vmatpush3.bf16.msra.mxu1 %v2003_v49 }
 0x733   :  { %v1306_v13 = vpop.f32.mrb[28].mxu0  ;;  %v1347_v14 = vpop.f32.mrb[28].mxu1 }
 0x734   :  { %v1353_v15 = vadd.f32 %v1306_v13, %v1270_v51  ;;  %v1308_v16 = vpop.f32.mrb[29].mxu0  ;;  %v1810_v17 = vpop.f32.mrb[29].mxu1  ;;  %v1370_v61 = vadd.f32 %v2365_v20, %v1347_v14 }
 0x735   :  { %v1310_v19 = vpop.f32.mrb[30].mxu0  ;;  %v1350_v52 = vpop.f32.mrb[30].mxu1  ;;  %v1363_v55 = vadd.f32 %v1361_v18, %v1308_v16 }
 0x736   :  { %v1565_v1 = vmul.f32 -1.442695, %v1353_v15  ;;  %v1311_v53 = vpop.f32.mrb[31].mxu0  ;;  %v1811_v54 = vpop.f32.mrb[31].mxu1 }
 0x737   :  { %v1566_v56 = vmul.f32 -1.442695, %v1363_v55 }
 0x738   :  { %1960 = vpow2.f32 %v1565_v1 }
 0x739   :  { %1962 = vpow2.f32 %v1566_v56 }
 0x742   :  { %v1961_v57 = vpop.eup %1960 }
 0x743   :  { %v1357_v58 = vadd.f32 1.0, %v1961_v57  ;;  %v1963_v59 = vpop.eup %1962 }
 0x744   :  { %v1367_v60 = vadd.f32 1.0, %v1963_v59 }
 0x745   :  { %1964 = vrcp.f32 %v1357_v58 }
 0x746   :  { %1966 = vrcp.f32 %v1367_v60 }
 0x74f   :  { %v1965_v62 = vpop.eup %1964 }
 0x750   :  { %v1371_v0 = vmul.f32 %v1965_v62, %v1370_v61  ;;  %v1967_v4 = vpop.eup %1966 }
 0x751   :  { %v1376_v5 = vsub.f32 1.0, %v1967_v4  ;;  %v1378_v8 = vmul.f32 %v1967_v4, %v2595_v27 }
 0x752   :  { %v1374_v3 = vadd.f32 %v1372_v63, %v1371_v0 }
 0x754   :  { %1968 = vtanh.f32 %v1374_v3 }
 0x75e   :  { %v1969_v6 = vpop.eup %1968 }
 0x75f   :  { %v1377_v7 = vmul.f32 %v1969_v6, %v1376_v5 }
 0x761   :  { %v1379_v9 = vadd.f32 %v1378_v8, %v1377_v7 }
 0x763   :  { %1567 = vst [vmem:[%s2696_s5 + $0xc] sm:$0x3] %v1379_v9  ;;  %v1384_v10 = vpack.c.bf16 %v1379_v9, %v1379_v9 }
 0x765   :  { %1418 = vmatmul.mubr.bf16.vlgmr.msra.gmra.mrb[32].mxu0 %v1384_v10  ;;  %1829 = vmatmul.mubr.bf16.vlgmr.msra.gmra.mrb[32].mxu1 %v1384_v10 }
 0x838   :  { %v1419_v12 = vpop.f32.mrb[32].mxu0  ;;  %v1460_v21 = vpop.f32.mrb[32].mxu1 }
 0x839   :  { %v1466_v22 = vadd.f32 %v1419_v12, %v1383_v11  ;;  %v1421_v23 = vpop.f32.mrb[33].mxu0  ;;  %v1830_v24 = vpop.f32.mrb[33].mxu1  ;;  %v1483_v36 = vadd.f32 %v2365_v20, %v1460_v21 }
 0x83a   :  { %v1423_v26 = vpop.f32.mrb[34].mxu0  ;;  %v1463_v28 = vpop.f32.mrb[34].mxu1  ;;  %v1476_v31 = vadd.f32 %v1474_v25, %v1421_v23 }
 0x83b   :  { %v1568_v29 = vmul.f32 -1.442695, %v1466_v22  ;;  %v1424_v30 = vpop.f32.mrb[35].mxu0  ;;  %v1831_v27 = vpop.f32.mrb[35].mxu1 }
 0x83c   :  { %v1569_v32 = vmul.f32 -1.442695, %v1476_v31 }
 0x83d   :  { %1970 = vpow2.f32 %v1568_v29 }
 0x83e   :  { %1972 = vpow2.f32 %v1569_v32 }
 0x847   :  { %v1971_v33 = vpop.eup %1970 }
 0x848   :  { %v1470_v34 = vadd.f32 1.0, %v1971_v33  ;;  %v1973_v2 = vpop.eup %1972 }
 0x849   :  { %v1480_v35 = vadd.f32 1.0, %v1973_v2 }
 0x84a   :  { %1974 = vrcp.f32 %v1470_v34 }
 0x84b   :  { %1976 = vrcp.f32 %v1480_v35 }
 0x854   :  { %v1975_v37 = vpop.eup %1974 }
 0x855   :  { %v1484_v39 = vmul.f32 %v1975_v37, %v1483_v36  ;;  %v1977_v41 = vpop.eup %1976 }
 0x856   :  { %v1489_v42 = vsub.f32 1.0, %v1977_v41  ;;  %v1491_v44 = vmul.f32 %v1977_v41, %v1379_v9 }
 0x857   :  { %v1487_v40 = vadd.f32 %v1485_v38, %v1484_v39 }
 0x859   :  { %1978 = vtanh.f32 %v1487_v40 }
 0x863   :  { %v1979_v43 = vpop.eup %1978 }
 0x864   :  { %v1490_v50 = vmul.f32 %v1979_v43, %v1489_v42 }
 0x866   :  { %v1492_v45 = vadd.f32 %v1491_v44, %v1490_v50 }
 0x868   :  { %1570 = vst [vmem:[%s2696_s5 + $0xe] sm:$0x3] %v1492_v45 }

</bundles_post_ra>
